<compile_context>
chip_gen: v7x
topology: tpu7x:2x2x1
jax: 0.10.0
libtpu: 0.0.40
codegen_flags: <defaults>
</compile_context>

<pallas_src>
import functools
import math

import jax
import jax.numpy as jnp
from jax.experimental import pallas as pl
from jax.experimental.pallas import tpu as pltpu

NEG_BIG = -1e30  # finite sentinel: keeps the softmax NaN-free for rows with no valid edge


def graph_attention_kernel(u_ref, v_ref, k_ref, hres_ref, e_ref, mask_ref,
                           w3_ref, w5_ref, ln_g_ref, ln_b_ref,
                           wm1_ref, bm1_ref, wm2_ref, bm2_ref,
                           out_ref,
                           m_sc, l_sc, acc_sc, *, eps):
    """Grid = (dst blocks [parallel], src tiles [arbitrary]); online softmax over src."""
    j = pl.program_id(1)
    tk_src, blk_d, hidden = e_ref.shape

    @pl.when(j == 0)
    def _init():
        m_sc[...] = jnp.full_like(m_sc, NEG_BIG)
        l_sc[...] = jnp.zeros_like(l_sc)
        acc_sc[...] = jnp.zeros_like(acc_sc)

    # Edge projections for the streamed tile only (MXU); tile-aligned reshapes.
    e = e_ref[...].reshape(tk_src * blk_d, hidden)
    x1 = jnp.dot(e, w3_ref[...],
                 preferred_element_type=jnp.float32).reshape(tk_src, blk_d, hidden)
    x2 = jnp.dot(e, w5_ref[...],
                 preferred_element_type=jnp.float32).reshape(tk_src, blk_d, hidden)

    mask = mask_ref[...]           # (tk_src, blk_d, 1): lane-broadcasts over hidden
    u = u_ref[...]                 # (tk_src, 1, hidden): pre-scaled by 1/sqrt(d_head)
    v = v_ref[...]                 # (blk_d, hidden)
    k = k_ref[...]                 # (blk_d, hidden)

    # All-head attention logits for this (dst block, src tile).
    logits = u * (v[None, :, :] + x1)                       # (tk_src, blk_d, hidden)
    logits = jnp.where(mask > 0.5, logits, NEG_BIG)

    # Online (streaming) softmax over the src axis (axis 0 = leading dim).
    m_new = jnp.maximum(m_sc[...], jnp.max(logits, axis=0))  # (blk_d, hidden)
    corr = jnp.exp(m_sc[...] - m_new)
    p = jnp.exp(logits - m_new[None, :, :]) * mask            # masked slots -> exact 0
    l_sc[...] = corr * l_sc[...] + jnp.sum(p, axis=0)
    acc_sc[...] = corr * acc_sc[...] + jnp.sum(p * (k[None, :, :] + x2), axis=0)
    m_sc[...] = m_new

    @pl.when(j == pl.num_programs(1) - 1)
    def _finalize():
        # Rows with no valid incoming edge (padded dst rows) get agg = 0.
        denom = jnp.where(l_sc[...] > 0.0, l_sc[...], 1.0)
        h = hres_ref[...] + acc_sc[...] / denom               # (blk_d, hidden)

        g = ln_g_ref[...]
        b = ln_b_ref[...]

        def layer_norm(x):
            mu = jnp.mean(x, axis=-1, keepdims=True)
            xc = x - mu
            var = jnp.mean(xc * xc, axis=-1, keepdims=True)
            return xc / jnp.sqrt(var + eps) * g + b

        h = layer_norm(h)
        hm = jnp.maximum(
            jnp.dot(h, wm1_ref[...], preferred_element_type=jnp.float32) + bm1_ref[...],
            0.0)
        hm = jnp.dot(hm, wm2_ref[...], preferred_element_type=jnp.float32) + bm2_ref[...]
        h = layer_norm(h + hm)
        # TODO(synk): dropout(p=0.2) is identity in eval mode (training=False);
        # training-mode stochastic dropout (pltpu.prng_*) is not implemented here.
        out_ref[...] = h.astype(out_ref.dtype)


def prepare_graph(e_ij, src, dst, num_nodes, *, blk_d=8, tk_src=8):
    """One-time graph prep (hoisted out of the forward): dense [src, dst] edge-feature
    tensor + adjacency mask, padded to the tiling. Assumes a simple graph (at most one
    edge per (src, dst) pair)."""
    hidden = e_ij.shape[-1]
    n_pad_d = blk_d * pl.cdiv(num_nodes, blk_d)
    n_pad_s = tk_src * pl.cdiv(num_nodes, tk_src)
    e_dense = jnp.zeros((n_pad_s, n_pad_d, hidden), jnp.float32).at[src, dst].set(
        e_ij.astype(jnp.float32))
    adj = jnp.zeros((n_pad_s, n_pad_d, 1), jnp.float32).at[src, dst, 0].set(1.0)
    return e_dense, adj


def graph_attention(h0, e_dense, adj, params, num_heads, *, blk_d=8, tk_src=8):
    """Forward pass of GraphAttention; returns updated node features (N, hidden).

    For real graphs grow blk_d/tk_src to 128-256 and cast the MXU operands to bf16;
    the demo shapes below are intentionally tiny."""
    (w1, w2, w3, w4, w5, w6, ln_g, ln_b, wm1, bm1, wm2, bm2) = params
    n, hidden = h0.shape
    n_pad_s, n_pad_d, _ = e_dense.shape
    scale = 1.0 / math.sqrt(hidden // num_heads)

    h0f = h0.astype(jnp.float32)
    h_src = jnp.pad(h0f, ((0, n_pad_s - n), (0, 0)))
    h_dst = jnp.pad(h0f, ((0, n_pad_d - n), (0, 0)))

    # Hoisted node-side projections: one XLA matmul each per forward (NOT per grid
    # step).  The 1/sqrt(d_head) scale is folded into u here.
    u = (jnp.dot(h_src, w1) * scale).reshape(n_pad_s, 1, hidden)
    v = jnp.dot(h_dst, w2)
    k = jnp.dot(h_dst, w4)
    h_res = jnp.dot(h_dst, w6)

    grid = (n_pad_d // blk_d, n_pad_s // tk_src)
    kernel = functools.partial(graph_attention_kernel, eps=1e-5)
    wmap2 = lambda i, j: (0, 0)

    out = pl.pallas_call(
        kernel,
        out_shape=jax.ShapeDtypeStruct((n_pad_d, hidden), jnp.float32),
        grid=grid,
        in_specs=[
            pl.BlockSpec((tk_src, 1, hidden), lambda i, j: (j, 0, 0)),      # u (src tile)
            pl.BlockSpec((blk_d, hidden), lambda i, j: (i, 0)),             # v (dst block)
            pl.BlockSpec((blk_d, hidden), lambda i, j: (i, 0)),             # k (dst block)
            pl.BlockSpec((blk_d, hidden), lambda i, j: (i, 0)),             # W6 h0 residual
            pl.BlockSpec((tk_src, blk_d, hidden), lambda i, j: (j, i, 0)),  # edge features
            pl.BlockSpec((tk_src, blk_d, 1), lambda i, j: (j, i, 0)),       # adjacency mask
            pl.BlockSpec((hidden, hidden), wmap2),                          # W3
            pl.BlockSpec((hidden, hidden), wmap2),                          # W5
            pl.BlockSpec((1, hidden), wmap2),                               # LayerNorm gamma
            pl.BlockSpec((1, hidden), wmap2),                               # LayerNorm beta
            pl.BlockSpec((hidden, 2 * hidden), wmap2),                      # MLP W1
            pl.BlockSpec((1, 2 * hidden), wmap2),                           # MLP b1
            pl.BlockSpec((2 * hidden, hidden), wmap2),                      # MLP W2
            pl.BlockSpec((1, hidden), wmap2),                               # MLP b2
        ],
        out_specs=pl.BlockSpec((blk_d, hidden), lambda i, j: (i, 0)),
        scratch_shapes=[pltpu.VMEM((blk_d, hidden), jnp.float32)] * 3,      # m, l, acc
        compiler_params=pltpu.CompilerParams(
            dimension_semantics=("parallel", "arbitrary"),
            vmem_limit_bytes=48 * 1024 * 1024),  # <=75% of v7x's 64 MiB; fine on v5e/v6e
    )(u, v, k, h_res, e_dense, adj, w3, w5, ln_g, ln_b, wm1, bm1, wm2, bm2)
    return out[:n]


def reference_forward(h0, e_ij, src, dst, params, num_heads):
    """Pure-JAX mirror of the PyTorch/DGL forward (edge-list form) for checking."""
    (w1, w2, w3, w4, w5, w6, ln_g, ln_b, wm1, bm1, wm2, bm2) = params
    n, hidden = h0.shape
    d_head = hidden // num_heads
    u = h0 @ w1
    v = h0 @ w2
    k = h0 @ w4
    x1 = e_ij @ w3
    x2 = e_ij @ w5
    logit = u[src] * (v[dst] + x1) / math.sqrt(d_head)           # (E, hidden)
    seg_max = jax.ops.segment_max(logit, dst, num_segments=n)
    p = jnp.exp(logit - seg_max[dst])
    seg_sum = jax.ops.segment_sum(p, dst, num_segments=n)
    alpha = p / seg_sum[dst]
    msg = alpha * (k[dst] + x2)
    agg = jax.ops.segment_sum(msg, dst, num_segments=n)
    h = h0 @ w6 + agg

    def layer_norm(x):
        mu = x.mean(-1, keepdims=True)
        var = ((x - mu) ** 2).mean(-1, keepdims=True)
        return (x - mu) / jnp.sqrt(var + 1e-5) * ln_g + ln_b

    h = layer_norm(h)
    hm = jnp.maximum(h @ wm1 + bm1, 0.0) @ wm2 + bm2
    return layer_norm(h + hm)


if __name__ == "__main__":
    # Keep wrapper/reference XLA matmuls at full f32 so they match the in-kernel MXU dots.
    jax.config.update("jax_default_matmul_precision", "highest")

    hidden_dim = 32
    num_heads = 4
    num_nodes = 20          # not a multiple of 8 -> exercises dst/src padding + mask
    blk_d = 8
    tk_src = 8              # grid = (3, 3): exercises online softmax across src tiles

    # Deterministic simple directed graph (no duplicate (src, dst) pairs).
    edges = set()
    for i in range(num_nodes):
        edges.add((i, (i + 1) % num_nodes))          # ring
        edges.add((i, (i + 5) % num_nodes))          # skip connections
        edges.add(((i * 7) % num_nodes, i))          # every node gets incoming edges
        if i % 3 == 0:
            edges.add((i, i))                        # some self-loops
    edges = sorted(edges)
    src = jnp.asarray([s for s, _ in edges], jnp.int32)
    dst = jnp.asarray([d for _, d in edges], jnp.int32)
    num_edges = len(edges)

    key = jax.random.PRNGKey(0)
    ks = jax.random.split(key, 14)
    wscale = 1.0 / math.sqrt(hidden_dim)
    h0 = jax.random.normal(ks[0], (num_nodes, hidden_dim), jnp.float32)
    e_ij = jax.random.normal(ks[1], (num_edges, hidden_dim), jnp.float32)
    # nn.Linear(hidden, hidden, bias=False): we store W = weight.T and apply x @ W.
    w1, w2, w3, w4, w5, w6 = [
        jax.random.normal(ks[i], (hidden_dim, hidden_dim), jnp.float32) * wscale
        for i in range(2, 8)]
    ln_g = 1.0 + 0.1 * jax.random.normal(ks[8], (1, hidden_dim), jnp.float32)
    ln_b = 0.1 * jax.random.normal(ks[9], (1, hidden_dim), jnp.float32)
    wm1 = jax.random.normal(ks[10], (hidden_dim, 2 * hidden_dim), jnp.float32) * wscale
    bm1 = 0.1 * jax.random.normal(ks[11], (1, 2 * hidden_dim), jnp.float32)
    wm2 = jax.random.normal(ks[12], (2 * hidden_dim, hidden_dim),
                            jnp.float32) / math.sqrt(2 * hidden_dim)
    bm2 = 0.1 * jax.random.normal(ks[13], (1, hidden_dim), jnp.float32)
    params = (w1, w2, w3, w4, w5, w6, ln_g, ln_b, wm1, bm1, wm2, bm2)

    # One-time graph densification (hoisted out of the forward call).
    e_dense, adj = prepare_graph(e_ij, src, dst, num_nodes, blk_d=blk_d, tk_src=tk_src)

    out = graph_attention(h0, e_dense, adj, params, num_heads,
                          blk_d=blk_d, tk_src=tk_src)
    jax.block_until_ready(out)

    ref = reference_forward(h0, e_ij, src, dst, params, num_heads)
    assert out.shape == (num_nodes, hidden_dim)
    max_err = float(jnp.max(jnp.abs(out - ref)))
    assert jnp.allclose(out, ref, rtol=2e-3, atol=2e-3), max_err

    print("KERNEL_OK")
</pallas_src>

<mosaic_0001>
module attributes {stable_mosaic.version = 11 : i64} {
  func.func @graph_attention_kernel(%arg0: i32, %arg1: i32, %arg2: memref<8x1x32xf32, #tpu.memory_space<vmem>>, %arg3: memref<8x32xf32, #tpu.memory_space<vmem>>, %arg4: memref<8x32xf32, #tpu.memory_space<vmem>>, %arg5: memref<8x32xf32, #tpu.memory_space<vmem>>, %arg6: memref<8x8x32xf32, #tpu.memory_space<vmem>>, %arg7: memref<8x8x1xf32, #tpu.memory_space<vmem>>, %arg8: memref<32x32xf32, #tpu.memory_space<vmem>>, %arg9: memref<32x32xf32, #tpu.memory_space<vmem>>, %arg10: memref<1x32xf32, #tpu.memory_space<vmem>>, %arg11: memref<1x32xf32, #tpu.memory_space<vmem>>, %arg12: memref<32x64xf32, #tpu.memory_space<vmem>>, %arg13: memref<1x64xf32, #tpu.memory_space<vmem>>, %arg14: memref<64x32xf32, #tpu.memory_space<vmem>>, %arg15: memref<1x32xf32, #tpu.memory_space<vmem>>, %arg16: memref<8x32xf32, #tpu.memory_space<vmem>>, %arg17: memref<8x32xf32, #tpu.memory_space<vmem>>, %arg18: memref<8x32xf32, #tpu.memory_space<vmem>>, %arg19: memref<8x32xf32, #tpu.memory_space<vmem>>) attributes {dimension_semantics = [#tpu.dimension_semantics<parallel>, #tpu.dimension_semantics<arbitrary>], iteration_bounds = array<i64: 3, 3>, scalar_prefetch = 0 : i64, scratch_operands = 3 : i64, tpu.core_type = #tpu.core_type<tc>, window_params = [{transform_indices = @transform_0, window_bounds = array<i64: 8, 1, 32>}, {transform_indices = @transform_1, window_bounds = array<i64: 8, 32>}, {transform_indices = @transform_2, window_bounds = array<i64: 8, 32>}, {transform_indices = @transform_3, window_bounds = array<i64: 8, 32>}, {transform_indices = @transform_4, window_bounds = array<i64: 8, 8, 32>}, {transform_indices = @transform_5, window_bounds = array<i64: 8, 8, 1>}, {pipeline_mode = #tpu.pipeline_mode<synchronous>, transform_indices = @transform_6, window_bounds = array<i64: 32, 32>}, {pipeline_mode = #tpu.pipeline_mode<synchronous>, transform_indices = @transform_7, window_bounds = array<i64: 32, 32>}, {pipeline_mode = #tpu.pipeline_mode<synchronous>, transform_indices = @transform_8, window_bounds = array<i64: 1, 32>}, {pipeline_mode = #tpu.pipeline_mode<synchronous>, transform_indices = @transform_9, window_bounds = array<i64: 1, 32>}, {pipeline_mode = #tpu.pipeline_mode<synchronous>, transform_indices = @transform_10, window_bounds = array<i64: 32, 64>}, {pipeline_mode = #tpu.pipeline_mode<synchronous>, transform_indices = @transform_11, window_bounds = array<i64: 1, 64>}, {pipeline_mode = #tpu.pipeline_mode<synchronous>, transform_indices = @transform_12, window_bounds = array<i64: 64, 32>}, {pipeline_mode = #tpu.pipeline_mode<synchronous>, transform_indices = @transform_13, window_bounds = array<i64: 1, 32>}, {transform_indices = @transform_14, window_bounds = array<i64: 8, 32>}]} {
    %c0_i32 = arith.constant 0 : i32
    %0 = arith.cmpi eq, %arg1, %c0_i32 : i32
    %1 = arith.extui %0 : i1 to i32
    %c0_i32_0 = arith.constant 0 : i32
    %2 = arith.cmpi ne, %1, %c0_i32_0 : i32
    scf.if %2 {
      %cst_38 = arith.constant -1.000000e+30 : f32
      %56 = vector.broadcast %cst_38 : f32 to vector<8x32xf32>
      %c0_39 = arith.constant 0 : index
      %c0_40 = arith.constant 0 : index
      %57 = vector.load %arg17[%c0_39, %c0_40] : memref<8x32xf32, #tpu.memory_space<vmem>>, vector<8x32xf32>
      tpu.vector_store %arg17[%c0_39, %c0_40], %56 {strides = array<i32>} : memref<8x32xf32, #tpu.memory_space<vmem>>, vector<8x32xf32>,
      %cst_41 = arith.constant 0.000000e+00 : f32
      %58 = vector.broadcast %cst_41 : f32 to vector<8x32xf32>
      %c0_42 = arith.constant 0 : index
      %c0_43 = arith.constant 0 : index
      %59 = vector.load %arg18[%c0_42, %c0_43] : memref<8x32xf32, #tpu.memory_space<vmem>>, vector<8x32xf32>
      tpu.vector_store %arg18[%c0_42, %c0_43], %58 {strides = array<i32>} : memref<8x32xf32, #tpu.memory_space<vmem>>, vector<8x32xf32>,
      %cst_44 = arith.constant 0.000000e+00 : f32
      %60 = vector.broadcast %cst_44 : f32 to vector<8x32xf32>
      %c0_45 = arith.constant 0 : index
      %c0_46 = arith.constant 0 : index
      %61 = vector.load %arg19[%c0_45, %c0_46] : memref<8x32xf32, #tpu.memory_space<vmem>>, vector<8x32xf32>
      tpu.vector_store %arg19[%c0_45, %c0_46], %60 {strides = array<i32>} : memref<8x32xf32, #tpu.memory_space<vmem>>, vector<8x32xf32>,
    } else {
    }
    %c0 = arith.constant 0 : index
    %c0_1 = arith.constant 0 : index
    %c0_2 = arith.constant 0 : index
    %3 = vector.load %arg6[%c0, %c0_1, %c0_2] : memref<8x8x32xf32, #tpu.memory_space<vmem>>, vector<8x8x32xf32>
    %4 = vector.shape_cast %3 : vector<8x8x32xf32> to vector<64x32xf32>
    %c0_3 = arith.constant 0 : index
    %c0_4 = arith.constant 0 : index
    %5 = vector.load %arg8[%c0_3, %c0_4] : memref<32x32xf32, #tpu.memory_space<vmem>>, vector<32x32xf32>
    %cst = arith.constant dense<0.000000e+00> : vector<64x32xf32>
    %6 = tpu.matmul %4, %5, %cst {dimension_numbers = #tpu.dot_dimension_numbers<[1], [0], [0], [1], [0, 0, 1, 1], [], []>, precision = #tpu.contract_precision<fp32>} : vector<64x32xf32>, vector<32x32xf32>, vector<64x32xf32> -> vector<64x32xf32>
    %7 = vector.shape_cast %6 : vector<64x32xf32> to vector<8x8x32xf32>
    %c0_5 = arith.constant 0 : index
    %c0_6 = arith.constant 0 : index
    %8 = vector.load %arg9[%c0_5, %c0_6] : memref<32x32xf32, #tpu.memory_space<vmem>>, vector<32x32xf32>
    %cst_7 = arith.constant dense<0.000000e+00> : vector<64x32xf32>
    %9 = tpu.matmul %4, %8, %cst_7 {dimension_numbers = #tpu.dot_dimension_numbers<[1], [0], [0], [1], [0, 0, 1, 1], [], []>, precision = #tpu.contract_precision<fp32>} : vector<64x32xf32>, vector<32x32xf32>, vector<64x32xf32> -> vector<64x32xf32>
    %10 = vector.shape_cast %9 : vector<64x32xf32> to vector<8x8x32xf32>
    %c0_8 = arith.constant 0 : index
    %c0_9 = arith.constant 0 : index
    %c0_10 = arith.constant 0 : index
    %11 = vector.load %arg7[%c0_8, %c0_9, %c0_10] : memref<8x8x1xf32, #tpu.memory_space<vmem>>, vector<8x8x1xf32>
    %c0_11 = arith.constant 0 : index
    %c0_12 = arith.constant 0 : index
    %c0_13 = arith.constant 0 : index
    %12 = vector.load %arg2[%c0_11, %c0_12, %c0_13] : memref<8x1x32xf32, #tpu.memory_space<vmem>>, vector<8x1x32xf32>
    %c0_14 = arith.constant 0 : index
    %c0_15 = arith.constant 0 : index
    %13 = vector.load %arg3[%c0_14, %c0_15] : memref<8x32xf32, #tpu.memory_space<vmem>>, vector<8x32xf32>
    %c0_16 = arith.constant 0 : index
    %c0_17 = arith.constant 0 : index
    %14 = vector.load %arg4[%c0_16, %c0_17] : memref<8x32xf32, #tpu.memory_space<vmem>>, vector<8x32xf32>
    %15 = vector.shape_cast %13 : vector<8x32xf32> to vector<1x8x32xf32>
    %16 = vector.broadcast %15 : vector<1x8x32xf32> to vector<8x8x32xf32>
    %17 = arith.addf %16, %7 : vector<8x8x32xf32>
    %18 = vector.broadcast %12 : vector<8x1x32xf32> to vector<8x8x32xf32>
    %19 = arith.mulf %18, %17 : vector<8x8x32xf32>
    %cst_18 = arith.constant 5.000000e-01 : f32
    %20 = vector.broadcast %cst_18 : f32 to vector<8x8x1xf32>
    %21 = arith.cmpf ogt, %11, %20 : vector<8x8x1xf32>
    %cst_19 = arith.constant -1.000000e+30 : f32
    %22 = vector.shape_cast %21 : vector<8x8x1xi1> to vector<8x8x1xi1>
    %23 = vector.broadcast %22 : vector<8x8x1xi1> to vector<8x8x32xi1>
    %24 = vector.broadcast %cst_19 : f32 to vector<8x8x32xf32>
    %25 = arith.select %23, %19, %24 : vector<8x8x32xi1>, vector<8x8x32xf32>
    %c0_20 = arith.constant 0 : index
    %c0_21 = arith.constant 0 : index
    %26 = vector.load %arg17[%c0_20, %c0_21] : memref<8x32xf32, #tpu.memory_space<vmem>>, vector<8x32xf32>
    %cst_22 = arith.constant dense<0xFF800000> : vector<8x32xf32>
    %27 = vector.multi_reduction <maximumf>, %25, %cst_22 [0] : vector<8x8x32xf32> to vector<8x32xf32>
    %28 = arith.maximumf %26, %27 : vector<8x32xf32>
    %c0_23 = arith.constant 0 : index
    %c0_24 = arith.constant 0 : index
    %29 = vector.load %arg17[%c0_23, %c0_24] : memref<8x32xf32, #tpu.memory_space<vmem>>, vector<8x32xf32>
    %30 = arith.subf %29, %28 : vector<8x32xf32>
    %31 = math.exp %30 : vector<8x32xf32>
    %32 = vector.shape_cast %28 : vector<8x32xf32> to vector<1x8x32xf32>
    %33 = vector.broadcast %32 : vector<1x8x32xf32> to vector<8x8x32xf32>
    %34 = arith.subf %25, %33 : vector<8x8x32xf32>
    %35 = math.exp %34 : vector<8x8x32xf32>
    %36 = vector.broadcast %11 : vector<8x8x1xf32> to vector<8x8x32xf32>
    %37 = arith.mulf %35, %36 : vector<8x8x32xf32>
    %c0_25 = arith.constant 0 : index
    %c0_26 = arith.constant 0 : index
    %38 = vector.load %arg18[%c0_25, %c0_26] : memref<8x32xf32, #tpu.memory_space<vmem>>, vector<8x32xf32>
    %39 = arith.mulf %31, %38 : vector<8x32xf32>
    %cst_27 = arith.constant dense<0.000000e+00> : vector<8x32xf32>
    %40 = vector.multi_reduction <add>, %37, %cst_27 [0] : vector<8x8x32xf32> to vector<8x32xf32>
    %41 = arith.addf %39, %40 : vector<8x32xf32>
    %c0_28 = arith.constant 0 : index
    %c0_29 = arith.constant 0 : index
    %42 = vector.load %arg18[%c0_28, %c0_29] : memref<8x32xf32, #tpu.memory_space<vmem>>, vector<8x32xf32>
    tpu.vector_store %arg18[%c0_28, %c0_29], %41 {strides = array<i32>} : memref<8x32xf32, #tpu.memory_space<vmem>>, vector<8x32xf32>,
    %c0_30 = arith.constant 0 : index
    %c0_31 = arith.constant 0 : index
    %43 = vector.load %arg19[%c0_30, %c0_31] : memref<8x32xf32, #tpu.memory_space<vmem>>, vector<8x32xf32>
    %44 = arith.mulf %31, %43 : vector<8x32xf32>
    %45 = vector.shape_cast %14 : vector<8x32xf32> to vector<1x8x32xf32>
    %46 = vector.broadcast %45 : vector<1x8x32xf32> to vector<8x8x32xf32>
    %47 = arith.addf %46, %10 : vector<8x8x32xf32>
    %48 = arith.mulf %37, %47 : vector<8x8x32xf32>
    %cst_32 = arith.constant dense<0.000000e+00> : vector<8x32xf32>
    %49 = vector.multi_reduction <add>, %48, %cst_32 [0] : vector<8x8x32xf32> to vector<8x32xf32>
    %50 = arith.addf %44, %49 : vector<8x32xf32>
    %c0_33 = arith.constant 0 : index
    %c0_34 = arith.constant 0 : index
    %51 = vector.load %arg19[%c0_33, %c0_34] : memref<8x32xf32, #tpu.memory_space<vmem>>, vector<8x32xf32>
    tpu.vector_store %arg19[%c0_33, %c0_34], %50 {strides = array<i32>} : memref<8x32xf32, #tpu.memory_space<vmem>>, vector<8x32xf32>,
    %c0_35 = arith.constant 0 : index
    %c0_36 = arith.constant 0 : index
    %52 = vector.load %arg17[%c0_35, %c0_36] : memref<8x32xf32, #tpu.memory_space<vmem>>, vector<8x32xf32>
    tpu.vector_store %arg17[%c0_35, %c0_36], %28 {strides = array<i32>} : memref<8x32xf32, #tpu.memory_space<vmem>>, vector<8x32xf32>,
    %c2_i32 = arith.constant 2 : i32
    %53 = arith.cmpi eq, %arg1, %c2_i32 : i32
    %54 = arith.extui %53 : i1 to i32
    %c0_i32_37 = arith.constant 0 : i32
    %55 = arith.cmpi ne, %54, %c0_i32_37 : i32
    scf.if %55 {
      %c0_38 = arith.constant 0 : index
      %c0_39 = arith.constant 0 : index
      %56 = vector.load %arg18[%c0_38, %c0_39] : memref<8x32xf32, #tpu.memory_space<vmem>>, vector<8x32xf32>
      %cst_40 = arith.constant 0.000000e+00 : f32
      %57 = vector.broadcast %cst_40 : f32 to vector<8x32xf32>
      %58 = arith.cmpf ogt, %56, %57 : vector<8x32xf32>
      %c0_41 = arith.constant 0 : index
      %c0_42 = arith.constant 0 : index
      %59 = vector.load %arg18[%c0_41, %c0_42] : memref<8x32xf32, #tpu.memory_space<vmem>>, vector<8x32xf32>
      %cst_43 = arith.constant 1.000000e+00 : f32
      %60 = vector.broadcast %cst_43 : f32 to vector<8x32xf32>
      %61 = arith.select %58, %59, %60 : vector<8x32xi1>, vector<8x32xf32>
      %c0_44 = arith.constant 0 : index
      %c0_45 = arith.constant 0 : index
      %62 = vector.load %arg5[%c0_44, %c0_45] : memref<8x32xf32, #tpu.memory_space<vmem>>, vector<8x32xf32>
      %c0_46 = arith.constant 0 : index
      %c0_47 = arith.constant 0 : index
      %63 = vector.load %arg19[%c0_46, %c0_47] : memref<8x32xf32, #tpu.memory_space<vmem>>, vector<8x32xf32>
      %64 = arith.divf %63, %61 : vector<8x32xf32>
      %65 = arith.addf %62, %64 : vector<8x32xf32>
      %c0_48 = arith.constant 0 : index
      %c0_49 = arith.constant 0 : index
      %66 = vector.load %arg10[%c0_48, %c0_49] : memref<1x32xf32, #tpu.memory_space<vmem>>, vector<1x32xf32>
      %c0_50 = arith.constant 0 : index
      %c0_51 = arith.constant 0 : index
      %67 = vector.load %arg11[%c0_50, %c0_51] : memref<1x32xf32, #tpu.memory_space<vmem>>, vector<1x32xf32>
      %cst_52 = arith.constant dense<0.000000e+00> : vector<8xf32>
      %68 = vector.multi_reduction <add>, %65, %cst_52 [1] : vector<8x32xf32> to vector<8xf32>
      %69 = vector.shape_cast %68 : vector<8xf32> to vector<8x1xf32>
      %cst_53 = arith.constant 3.200000e+01 : f32
      %70 = vector.broadcast %cst_53 : f32 to vector<8x1xf32>
      %71 = arith.divf %69, %70 : vector<8x1xf32>
      %72 = vector.broadcast %71 : vector<8x1xf32> to vector<8x32xf32>
      %73 = arith.subf %65, %72 : vector<8x32xf32>
      %74 = arith.mulf %73, %73 : vector<8x32xf32>
      %cst_54 = arith.constant dense<0.000000e+00> : vector<8xf32>
      %75 = vector.multi_reduction <add>, %74, %cst_54 [1] : vector<8x32xf32> to vector<8xf32>
      %76 = vector.shape_cast %75 : vector<8xf32> to vector<8x1xf32>
      %cst_55 = arith.constant 3.200000e+01 : f32
      %77 = vector.broadcast %cst_55 : f32 to vector<8x1xf32>
      %78 = arith.divf %76, %77 : vector<8x1xf32>
      %cst_56 = arith.constant 9.99999974E-6 : f32
      %79 = vector.broadcast %cst_56 : f32 to vector<8x1xf32>
      %80 = arith.addf %78, %79 : vector<8x1xf32>
      %81 = math.sqrt %80 : vector<8x1xf32>
      %82 = vector.broadcast %81 : vector<8x1xf32> to vector<8x32xf32>
      %83 = arith.divf %73, %82 : vector<8x32xf32>
      %84 = vector.broadcast %66 : vector<1x32xf32> to vector<8x32xf32>
      %85 = arith.mulf %83, %84 : vector<8x32xf32>
      %86 = vector.broadcast %67 : vector<1x32xf32> to vector<8x32xf32>
      %87 = arith.addf %85, %86 : vector<8x32xf32>
      %c0_57 = arith.constant 0 : index
      %c0_58 = arith.constant 0 : index
      %88 = vector.load %arg12[%c0_57, %c0_58] : memref<32x64xf32, #tpu.memory_space<vmem>>, vector<32x64xf32>
      %cst_59 = arith.constant dense<0.000000e+00> : vector<8x64xf32>
      %89 = tpu.matmul %87, %88, %cst_59 {dimension_numbers = #tpu.dot_dimension_numbers<[1], [0], [0], [1], [0, 0, 1, 1], [], []>, precision = #tpu.contract_precision<fp32>} : vector<8x32xf32>, vector<32x64xf32>, vector<8x64xf32> -> vector<8x64xf32>
      %c0_60 = arith.constant 0 : index
      %c0_61 = arith.constant 0 : index
      %90 = vector.load %arg13[%c0_60, %c0_61] : memref<1x64xf32, #tpu.memory_space<vmem>>, vector<1x64xf32>
      %91 = vector.broadcast %90 : vector<1x64xf32> to vector<8x64xf32>
      %92 = arith.addf %89, %91 : vector<8x64xf32>
      %cst_62 = arith.constant 0.000000e+00 : f32
      %93 = vector.broadcast %cst_62 : f32 to vector<8x64xf32>
      %94 = arith.maximumf %92, %93 : vector<8x64xf32>
      %c0_63 = arith.constant 0 : index
      %c0_64 = arith.constant 0 : index
      %95 = vector.load %arg14[%c0_63, %c0_64] : memref<64x32xf32, #tpu.memory_space<vmem>>, vector<64x32xf32>
      %cst_65 = arith.constant dense<0.000000e+00> : vector<8x32xf32>
      %96 = tpu.matmul %94, %95, %cst_65 {dimension_numbers = #tpu.dot_dimension_numbers<[1], [0], [0], [1], [0, 0, 1, 1], [], []>, precision = #tpu.contract_precision<fp32>} : vector<8x64xf32>, vector<64x32xf32>, vector<8x32xf32> -> vector<8x32xf32>
      %c0_66 = arith.constant 0 : index
      %c0_67 = arith.constant 0 : index
      %97 = vector.load %arg15[%c0_66, %c0_67] : memref<1x32xf32, #tpu.memory_space<vmem>>, vector<1x32xf32>
      %98 = vector.broadcast %97 : vector<1x32xf32> to vector<8x32xf32>
      %99 = arith.addf %96, %98 : vector<8x32xf32>
      %100 = arith.addf %87, %99 : vector<8x32xf32>
      %cst_68 = arith.constant dense<0.000000e+00> : vector<8xf32>
      %101 = vector.multi_reduction <add>, %100, %cst_68 [1] : vector<8x32xf32> to vector<8xf32>
      %102 = vector.shape_cast %101 : vector<8xf32> to vector<8x1xf32>
      %cst_69 = arith.constant 3.200000e+01 : f32
      %103 = vector.broadcast %cst_69 : f32 to vector<8x1xf32>
      %104 = arith.divf %102, %103 : vector<8x1xf32>
      %105 = vector.broadcast %104 : vector<8x1xf32> to vector<8x32xf32>
      %106 = arith.subf %100, %105 : vector<8x32xf32>
      %107 = arith.mulf %106, %106 : vector<8x32xf32>
      %cst_70 = arith.constant dense<0.000000e+00> : vector<8xf32>
      %108 = vector.multi_reduction <add>, %107, %cst_70 [1] : vector<8x32xf32> to vector<8xf32>
      %109 = vector.shape_cast %108 : vector<8xf32> to vector<8x1xf32>
      %cst_71 = arith.constant 3.200000e+01 : f32
      %110 = vector.broadcast %cst_71 : f32 to vector<8x1xf32>
      %111 = arith.divf %109, %110 : vector<8x1xf32>
      %cst_72 = arith.constant 9.99999974E-6 : f32
      %112 = vector.broadcast %cst_72 : f32 to vector<8x1xf32>
      %113 = arith.addf %111, %112 : vector<8x1xf32>
      %114 = math.sqrt %113 : vector<8x1xf32>
      %115 = vector.broadcast %114 : vector<8x1xf32> to vector<8x32xf32>
      %116 = arith.divf %106, %115 : vector<8x32xf32>
      %117 = vector.broadcast %66 : vector<1x32xf32> to vector<8x32xf32>
      %118 = arith.mulf %116, %117 : vector<8x32xf32>
      %119 = vector.broadcast %67 : vector<1x32xf32> to vector<8x32xf32>
      %120 = arith.addf %118, %119 : vector<8x32xf32>
      %c0_73 = arith.constant 0 : index
      %c0_74 = arith.constant 0 : index
      %121 = vector.load %arg16[%c0_73, %c0_74] : memref<8x32xf32, #tpu.memory_space<vmem>>, vector<8x32xf32>
      tpu.vector_store %arg16[%c0_73, %c0_74], %120 {strides = array<i32>} : memref<8x32xf32, #tpu.memory_space<vmem>>, vector<8x32xf32>,
    } else {
    }
    return
  }
  func.func @transform_0(%arg0: i32, %arg1: i32) -> (i32, i32, i32) {
    %c0_i32 = arith.constant 0 : i32
    %c0_i32_0 = arith.constant 0 : i32
    %c0_i32_1 = arith.constant 0 : i32
    return %arg1, %c0_i32, %c0_i32_0 : i32, i32, i32
  }
  func.func @transform_1(%arg0: i32, %arg1: i32) -> (i32, i32) {
    %c0_i32 = arith.constant 0 : i32
    %c0_i32_0 = arith.constant 0 : i32
    return %arg0, %c0_i32 : i32, i32
  }
  func.func @transform_2(%arg0: i32, %arg1: i32) -> (i32, i32) {
    %c0_i32 = arith.constant 0 : i32
    %c0_i32_0 = arith.constant 0 : i32
    return %arg0, %c0_i32 : i32, i32
  }
  func.func @transform_3(%arg0: i32, %arg1: i32) -> (i32, i32) {
    %c0_i32 = arith.constant 0 : i32
    %c0_i32_0 = arith.constant 0 : i32
    return %arg0, %c0_i32 : i32, i32
  }
  func.func @transform_4(%arg0: i32, %arg1: i32) -> (i32, i32, i32) {
    %c0_i32 = arith.constant 0 : i32
    %c0_i32_0 = arith.constant 0 : i32
    return %arg1, %arg0, %c0_i32 : i32, i32, i32
  }
  func.func @transform_5(%arg0: i32, %arg1: i32) -> (i32, i32, i32) {
    %c0_i32 = arith.constant 0 : i32
    %c0_i32_0 = arith.constant 0 : i32
    return %arg1, %arg0, %c0_i32 : i32, i32, i32
  }
  func.func @transform_6(%arg0: i32, %arg1: i32) -> (i32, i32) {
    %c0_i32 = arith.constant 0 : i32
    %c0_i32_0 = arith.constant 0 : i32
    %c0_i32_1 = arith.constant 0 : i32
    return %c0_i32, %c0_i32_0 : i32, i32
  }
  func.func @transform_7(%arg0: i32, %arg1: i32) -> (i32, i32) {
    %c0_i32 = arith.constant 0 : i32
    %c0_i32_0 = arith.constant 0 : i32
    %c0_i32_1 = arith.constant 0 : i32
    return %c0_i32, %c0_i32_0 : i32, i32
  }
  func.func @transform_8(%arg0: i32, %arg1: i32) -> (i32, i32) {
    %c0_i32 = arith.constant 0 : i32
    %c0_i32_0 = arith.constant 0 : i32
    %c0_i32_1 = arith.constant 0 : i32
    return %c0_i32, %c0_i32_0 : i32, i32
  }
  func.func @transform_9(%arg0: i32, %arg1: i32) -> (i32, i32) {
    %c0_i32 = arith.constant 0 : i32
    %c0_i32_0 = arith.constant 0 : i32
    %c0_i32_1 = arith.constant 0 : i32
    return %c0_i32, %c0_i32_0 : i32, i32
  }
  func.func @transform_10(%arg0: i32, %arg1: i32) -> (i32, i32) {
    %c0_i32 = arith.constant 0 : i32
    %c0_i32_0 = arith.constant 0 : i32
    %c0_i32_1 = arith.constant 0 : i32
    return %c0_i32, %c0_i32_0 : i32, i32
  }
  func.func @transform_11(%arg0: i32, %arg1: i32) -> (i32, i32) {
    %c0_i32 = arith.constant 0 : i32
    %c0_i32_0 = arith.constant 0 : i32
    %c0_i32_1 = arith.constant 0 : i32
    return %c0_i32, %c0_i32_0 : i32, i32
  }
  func.func @transform_12(%arg0: i32, %arg1: i32) -> (i32, i32) {
    %c0_i32 = arith.constant 0 : i32
    %c0_i32_0 = arith.constant 0 : i32
    %c0_i32_1 = arith.constant 0 : i32
    return %c0_i32, %c0_i32_0 : i32, i32
  }
  func.func @transform_13(%arg0: i32, %arg1: i32) -> (i32, i32) {
    %c0_i32 = arith.constant 0 : i32
    %c0_i32_0 = arith.constant 0 : i32
    %c0_i32_1 = arith.constant 0 : i32
    return %c0_i32, %c0_i32_0 : i32, i32
  }
  func.func @transform_14(%arg0: i32, %arg1: i32) -> (i32, i32) {
    %c0_i32 = arith.constant 0 : i32
    %c0_i32_0 = arith.constant 0 : i32
    return %arg0, %c0_i32 : i32, i32
  }
}

</mosaic_0001>

<bundles_post_ra>
// kernel: tpu_custom_call.1
= control target key start
LH: loop header
LB: loop body
LE: loop exit
PB: predicated region body
PF: predicated region fallthrough
CT: control target
= control target key end

     0   :  { %s6584_s0 = inlined_call_operand.hbm [shape: f32[24,1,32], index: 0, kind: input, shape index: {}]   ;;  %s6585_s1 = inlined_call_operand.hbm [shape: f32[24,32], index: 1, kind: input, shape index: {}]   ;;  %s6586_s2 = inlined_call_operand.hbm [shape: f32[24,32], index: 2, kind: input, shape index: {}]   ;;  %s6587_s3 = inlined_call_operand.hbm [shape: f32[24,32], index: 3, kind: input, shape index: {}]   ;;  %s6588_s4 = inlined_call_operand.vmem [shape: f32[24,24,32], index: 4, kind: input, shape index: {}]   ;;  %s6589_s5 = inlined_call_operand.vmem [shape: f32[24,24,1], index: 5, kind: input, shape index: {}]   ;;  %s6590_s6 = inlined_call_operand.vmem [shape: f32[32,32], index: 6, kind: input, shape index: {}]   ;;  %s6591_s7 = inlined_call_operand.vmem [shape: f32[32,32], index: 7, kind: input, shape index: {}]   ;;  %s6592_s8 = inlined_call_operand.vmem [shape: f32[1,32], index: 8, kind: input, shape index: {}]   ;;  %s6593_s9 = inlined_call_operand.vmem [shape: f32[1,32], index: 9, kind: input, shape index: {}]   ;;  %s6594_s10 = inlined_call_operand.vmem [shape: f32[32,64], index: 10, kind: input, shape index: {}]   ;;  %s6595_s11 = inlined_call_operand.vmem [shape: f32[1,64], index: 11, kind: input, shape index: {}]   ;;  %s6596_s12 = inlined_call_operand.vmem [shape: f32[64,32], index: 12, kind: input, shape index: {}]   ;;  %s6597_s13 = inlined_call_operand.vmem [shape: f32[1,32], index: 13, kind: input, shape index: {}]   ;;  %s6598_s14 = inlined_call_operand.hbm [shape: f32[24,32], index: 14, kind: output, shape index: {}]  }
   0x1   :  { %6619 = sst [smem:[#allocation34_spill]] %s6584_s0 }
   0x2   :  { %6620 = sst [smem:[#allocation35_spill]] %s6585_s1 }
   0x3   :  { %6621 = sst [smem:[#allocation36_spill]] %s6590_s6 }
   0x4   :  { %6622 = sst [smem:[#allocation37_spill]] %s6591_s7 }
   0x5   :  { %6623 = sst [smem:[#allocation38_spill]] %s6592_s8 }
   0x6   :  { %6624 = sst [smem:[#allocation39_spill]] %s6593_s9 }
   0x7   :  { %6625 = sst [smem:[#allocation40_spill]] %s6594_s10 }
   0x8   :  { %6626 = sst [smem:[#allocation41_spill]] %s6595_s11 }
   0x9   :  { %6627 = sst [smem:[#allocation42_spill]] %s6596_s12 }
   0xa   :  { %6628 = sst [smem:[#allocation43_spill]] %s6597_s13 }
   0xb   :  { %6629 = sst [smem:[#allocation44_spill]] %s6598_s14 }
   0xc   :  { %19 = vsyncpa [#allocation6], 0 }
   0xd   :  { %21 = vsyncpa [#allocation6 + $0x1], 0 }
   0xe   :  { %22 = vsyncpa [#allocation9], 0 }
   0xf   :  { %24 = vsyncpa [#allocation9 + $0x1], 0 }
  0x10   :  { %25 = vsyncpa [#allocation12], 0 }
  0x11   :  { %27 = vsyncpa [#allocation12 + $0x1], 0 }
  0x12   :  { %28 = vsyncpa [#allocation7], 0 }
  0x13   :  { %30 = vsyncpa [#allocation7 + $0x1], 0  ;;  %s5516_s29 = smov 0   ;;  %s5518_s30 = smov 0  }
  0x14   :  { %s5520_s15 = smov 0   ;;  %s5522_s16 = smov 0  }
  0x15   :  { %s5524_s17 = smov 0   ;;  %s5526_s18 = smov 0  }
  0x16   :  { %s5528_s19 = smov 0   ;;  %s5530_s20 = smov 0  }
  0x17   :  { %s5532_s21 = smov 0   ;;  %s5534_s22 = smov 0  }
  0x18   :  { %s5536_s23 = smov 0   ;;  %s5538_s24 = smov 0  }
  0x19   :  { %s5540_s25 = smov 0  }
  0x1a LB: > { %6630 = sst [smem:[#allocation20_spill]] %s5378_s29  ;;  %s5580_s26 = sadd.s32 4294967295, %s5426_s25   ;;  %s5426_s25 = sphi %s5540_s25, %s36_s25   ;;  %s5422_s24 = sphi %s5538_s24, %s6703_s24   ;;  %s5418_s23 = sphi %s5536_s23, %s6702_s23   ;;  %s5414_s22 = sphi %s5534_s22, %s6701_s22   ;;  %s5410_s21 = sphi %s5532_s21, %s6700_s21   ;;  %s5406_s20 = sphi %s5530_s20, %s6699_s20   ;;  %s5402_s19 = sphi %s5528_s19, %s6698_s19   ;;  %s5398_s18 = sphi %s5526_s18, %s6697_s18   ;;  %s5394_s17 = sphi %s5524_s17, %s6696_s17   ;;  %s5390_s16 = sphi %s5522_s16, %s6695_s16   ;;  %s5386_s15 = sphi %s5520_s15, %s6688_s15   ;;  %s5382_s30 = sphi %s5518_s30, %s6694_s30   ;;  %s5378_s29 = sphi %s5516_s29, %s6693_s29  }
  0x1b   : > { %6631 = sst [smem:[#allocation21_spill]] %s5386_s15  ;;  %s45_s28 = sadd.s32 1, %s5418_s23 }
  0x1c   : > { %6632 = sst [smem:[#allocation22_spill]] %s5390_s16  ;;  %s48_s14 = sadd.s32 1, %s5422_s24 }
  0x1d   : > { %6633 = sst [smem:[#allocation23_spill]] %s5410_s21  ;;  %p46_p0 = scmp.ge.s32.totalorder %s45_s28, 3 }
  0x1e   : > { %6634 = sst [smem:[#allocation24_spill]] %s5414_s22  ;;  %s55_s22 = sadd.s32 1, %s5406_s20 }
  0x1f   : > { %6635 = sst [smem:[#allocation25_spill]] %s5580_s26  ;;  %p62_p1 = scmp.ne.s32.totalorder %s5406_s20, %s5402_s19 }
  0x20   : > { %p63_p2 = scmp.eq.s32.totalorder %s5426_s25, 0  ;;  %s6705_s28 = smov (%p46_p0, %s45_s28), 0 }
  0x21   : > { %6636 = sst [smem:[#allocation26_spill]] %s6705_s28  ;;  %s6707_s14 = smov (!%p46_p0, %s48_s14), %s5422_s24 }
  0x22   : > { %s52_s27 = ssub.s32 %s5418_s23, %s6705_s28  ;;  %p5596_p3 = por %p63_p2, %p62_p1 }
  0x23   : > { %p50_p4 = scmp.ge.s32.totalorder %s6707_s14, 3  ;;  %p53_p5 = scmp.eq.s32.totalorder %s52_s27, 0 }
  0x24   : > { %p68_p6 = scmp.ne.s32.totalorder %s5402_s19, %s5398_s18  ;;  %p69_p7 = scmp.eq.s32.totalorder %s5580_s26, 0 }
  0x25   : > { %s6709_s14 = smov (%p50_p4, %s6707_s14), 0  ;;  %s81_s18 = sadd.s32 1, %s5394_s17 }
  0x26   : > { %6638 = sst [smem:[#allocation27_spill]] %s6709_s14  ;;  %p5607_p8 = por %p69_p7, %p68_p6 }
  0x27   : > { %s5605_s28 = scalar_select %p53_p5, %s5406_s20, %s55_s22  }
  0x28   : > { %s6640_s11 = scalar_select %p5607_p8, 1, 0 }
  0x29   : > { %6639 = sst [smem:[#allocation28_spill]] %s5605_s28  ;;  %s78_s12 = ssub.s32 %s5422_s24, %s6709_s14 }
  0x2a   : > { %p79_p9 = scmp.eq.s32.totalorder %s78_s12, 0  ;;  %p88_p10 = scmp.ne.s32.totalorder %s5394_s17, %s5390_s16 }
  0x2b   : > { %p94_p11 = scmp.ne.s32.totalorder %s5390_s16, %s5386_s15  ;;  %s158_s14 = sor.u32 %s78_s12, %s52_s27 }
  0x2c   : > { %s5619_s9 = scalar_select %p79_p9, %s5394_s17, %s81_s18  }
  0x2d   : > { %p5626_p12 = por %p88_p10, %p63_p2  ;;  %p5633_p13 = por %p94_p11, %p69_p7 }
  0x2e   : > { %6641 = sst [smem:[#allocation29_spill]] %s5619_s9  ;;  %s161_s8 = sadd.s32 1, %s5382_s30 }
  0x2f   : > { %s6643_s28 = scalar_select %p5633_p13, 1, 0 }
  0x30   : > { %p159_p0 = scmp.eq.s32.totalorder %s158_s14, 0  ;;  %p168_p1 = scmp.ne.s32.totalorder %s5382_s30, %s5378_s29 }
  0x31   : > { %6644 = sst [smem:[#allocation30_spill]] %s6643_s28  ;;  %p394_p4 = scmp.eq.s32.totalorder %s5580_s26, 8 }
  0x32   : > { %s6645_s10 = sadd.s32 4294967294, %s5426_s25   ;;  %p5648_p6 = por %p168_p1, %p63_p2 }
  0x33   : > { %p400_p5 = scmp.eq.s32.totalorder %s6645_s10, 8  ;;  %p5655_p9 = por %p394_p4, %p88_p10 }
  0x34   : > { %s5644_s18 = scalar_select %p159_p0, %s5382_s30, %s161_s8  }
  0x35   : > { %s6647_s9 = scalar_select %p5648_p6, 1, 0 }
  0x36   : > { %6646 = sst [smem:[#allocation31_spill]] %s5644_s18  ;;  %p5662_p7 = por %p400_p5, %p94_p11 }
  0x37   : > { %s6648_s7 = scalar_select %p5655_p9, 1, 0 }
  0x38   : > { %s6650_s12 = scalar_select %p5662_p7, 1, 0 }
  0x39   : > { %6649 = sst [smem:[#allocation32_spill]] %s6648_s7  ;;  %p4022_p13 = scmp.ge.s32.totalorder %s5426_s25, 9 }
  0x3a   : > { %6651 = sst [smem:[#allocation33_spill]] %s6650_s12  ;;  %s465_s8 = sand.u32 (!%p4022_p13), 1, %s5426_s25  }
  0x3b   : > { %440 = sbr.rel (%p4022_p13) target bundleno = 188 (0xbc), region = 48  ;;  %s6611_s10 = sand.u32 (!%p4022_p13), 1, %s5394_s17  }
  0x3c   : > { %s5671_s14 = sshll.u32 (!%p4022_p13), %s6611_s10, 3  ;;  %s5674_s27 = sshll.u32 (!%p4022_p13), %s5422_s24, 7 }
  0x3d   : > { %s6652_s1 = sld [smem:[#allocation35_spill]] (!%p4022_p13)  ;;  %s469_s7 = scalar_lea.vmem (!%p4022_p13), [#allocation8], %s5671_s14 }
  0x3e   : > { %s476_s6 = sshll.u32 (!%p4022_p13), %s469_s7, 4  ;;  %s444_s21 = sand.u32 (!%p4022_p13), 1, %s5406_s20   ;;  %s5683_s6 = int_to_ptr.vmem [resolvable:$true] %s476_s6 }
  0x3f   : > { %s5686_s10 = scalar_lea.sflag (!%p4022_p13), [#allocation9], %s465_s8 }
  0x43   : > { %s5680_s15 = scalar_lea.hbm %s6652_s1, %s5674_s27  ;;  %s5172_s12 = scalar_lea.hbm %s6652_s1, 384 }
  0x44   : > { %s5168_s29 = scalar_lea.hbm %s5680_s15, 128  ;;  %p5173_p13 = scmp.lt.u32.totalorder %s5680_s15, %s6652_s1 }
  0x45   : > { %p5169_p2 = scmp.ne.s32.totalorder %s5680_s15, %s5168_s29  ;;  %p5174_p0 = scmp.lt.u32.totalorder %s5172_s12, %s5168_s29 }
  0x46   : > { %p5176_p4 = scmp.lt.u32.totalorder %s5168_s29, %s5680_s15 }
  0x47   : > { %p5170_p10 = pnand %p5169_p2, %p5626_p12  ;;  %p5175_p1 = por %p5174_p0, %p5173_p13 }
  0x49   : > { %p5171_p11 = pneg %p5170_p10  ;;  %p5177_p5 = por %p5176_p4, %p5175_p1 }
  0x4b   : > { %p5178_p7 = pnand %p5177_p5, %p5171_p11 }
  0x4d   : > { %5181 = shalt.err (!%p5178_p7)
}
  0x4e   : > { %s5182_s7 = scalar_lea.vmem %s5683_s6, 128  ;;  %s5428_s28 = smov [#allocation8]  }
  0x4f   : > { %p5183_p2 = scmp.ne.s32.totalorder %s5683_s6, %s5182_s7  ;;  %s5186_s8 = sshll.u32 %s5428_s28, 4  ;;  %s5187_s8 = int_to_ptr.vmem [resolvable:$false] %s5186_s8 }
  0x50   : > { %s5188_s16 = scalar_lea.vmem %s5187_s8, 256  ;;  %p5189_p8 = scmp.lt.s32.totalorder %s5683_s6, %s5187_s8 }
  0x51   : > { %p5184_p10 = pnand %p5183_p2, %p5626_p12  ;;  %p5190_p6 = scmp.lt.s32.totalorder %s5188_s16, %s5182_s7 }
  0x53   : > { %p5185_p9 = pneg %p5184_p10  ;;  %p5191_p13 = por %p5190_p6, %p5189_p8 }
  0x55   : > { %p5192_p0 = pnand %p5191_p13, %p5185_p9 }
  0x57   : > { %5195 = shalt.err (!%p5192_p0)
}
  0x58   : > { %5012 = dma.hbm_to_vmem [thread:$0]  (%p5626_p12), %s5680_s15, 128, %s5683_s6, %s5686_s10  }
  0x59   : > { %s4023_s29 = sshll.u32 %s444_s21, 3  ;;  %s4066_s26 = sshll.u32 %s5418_s23, 7 }
  0x5a   : > { %s6653_s0 = sld [smem:[#allocation34_spill]]  ;;  %s448_s28 = scalar_lea.vmem [#allocation5], %s4023_s29 }
  0x5b   : > { %s455_s8 = sshll.u32 %s448_s28, 4  ;;  %s5722_s16 = scalar_lea.sflag [#allocation6], %s444_s21  ;;  %s5718_s8 = int_to_ptr.vmem [resolvable:$true] %s455_s8 }
  0x60   : > { %s5716_s7 = scalar_lea.hbm %s6653_s0, %s4066_s26  ;;  %s5200_s26 = scalar_lea.hbm %s6653_s0, 384 }
  0x61   : > { %s5196_s6 = scalar_lea.hbm %s5716_s7, 128  ;;  %p5201_p7 = scmp.lt.u32.totalorder %s5716_s7, %s6653_s0 }
  0x62   : > { %p5197_p8 = scmp.ne.s32.totalorder %s5716_s7, %s5196_s6  ;;  %p5202_p11 = scmp.lt.u32.totalorder %s5200_s26, %s5196_s6 }
  0x63   : > { %p5204_p4 = scmp.lt.u32.totalorder %s5196_s6, %s5716_s7 }
  0x64   : > { %p5198_p6 = pnand %p5197_p8, %p5596_p3  ;;  %p5203_p1 = por %p5202_p11, %p5201_p7 }
  0x66   : > { %p5199_p9 = pneg %p5198_p6  ;;  %p5205_p5 = por %p5204_p4, %p5203_p1 }
  0x68   : > { %p5206_p2 = pnand %p5205_p5, %p5199_p9 }
  0x6a   : > { %5209 = shalt.err (!%p5206_p2)
}
  0x6b   : > { %s5210_s21 = scalar_lea.vmem %s5718_s8, 128  ;;  %s5429_s29 = smov [#allocation5]  }
  0x6c   : > { %p5211_p10 = scmp.ne.s32.totalorder %s5718_s8, %s5210_s21  ;;  %s5214_s28 = sshll.u32 %s5429_s29, 4  ;;  %s5215_s28 = int_to_ptr.vmem [resolvable:$false] %s5214_s28 }
  0x6d   : > { %s5216_s1 = scalar_lea.vmem %s5215_s28, 256  ;;  %p5217_p8 = scmp.lt.s32.totalorder %s5718_s8, %s5215_s28 }
  0x6e   : > { %p5212_p13 = pnand %p5211_p10, %p5596_p3  ;;  %p5218_p6 = scmp.lt.s32.totalorder %s5216_s1, %s5210_s21 }
  0x70   : > { %p5213_p0 = pneg %p5212_p13  ;;  %p5219_p7 = por %p5218_p6, %p5217_p8 }
  0x72   : > { %p5220_p11 = pnand %p5219_p7, %p5213_p0 }
  0x74   : > { %5223 = shalt.err (!%p5220_p11)
}
  0x75   : > { %s5430_s6 = smov 16   ;;  %s5431_s15 = smov 1  }
  0x76   : > { %5011 = dma.hbm_to_vmem [thread:$0]  (%p5596_p3), %s5716_s7, 128, %s5718_s8, %s5722_s16, %s5430_s6, %s5430_s6, %s5431_s15  }
  0x77   : > { %s5750_s12 = scalar_lea.hbm %s6586_s2, %s5674_s27  ;;  %s487_s21 = scalar_lea.vmem [#allocation10], %s5671_s14 }
  0x78   : > { %s494_s29 = sshll.u32 %s487_s21, 4  ;;  %s5224_s28 = scalar_lea.hbm %s5750_s12, 128  ;;  %s495_s29 = int_to_ptr.vmem [resolvable:$true] %s494_s29 }
  0x79   : > { %p5225_p9 = scmp.ne.s32.totalorder %s5750_s12, %s5224_s28  ;;  %s5228_s7 = scalar_lea.hbm %s6586_s2, 384 }
  0x7a   : > { %p5229_p3 = scmp.lt.u32.totalorder %s5750_s12, %s6586_s2  ;;  %p5230_p5 = scmp.lt.u32.totalorder %s5228_s7, %s5224_s28 }
  0x7b   : > { %p5226_p1 = pnand %p5225_p9, %p5626_p12  ;;  %p5232_p10 = scmp.lt.u32.totalorder %s5224_s28, %s5750_s12 }
  0x7c   : > { %p5231_p2 = por %p5230_p5, %p5229_p3 }
  0x7d   : > { %p5227_p4 = pneg %p5226_p1 }
  0x7e   : > { %p5233_p13 = por %p5232_p10, %p5231_p2 }
  0x80   : > { %p5234_p0 = pnand %p5233_p13, %p5227_p4 }
  0x82   : > { %5237 = shalt.err (!%p5234_p0)
}
  0x83   : > { %s5238_s6 = scalar_lea.vmem %s495_s29, 128  ;;  %s5432_s15 = smov [#allocation10]  }
  0x84   : > { %p5239_p8 = scmp.ne.s32.totalorder %s495_s29, %s5238_s6  ;;  %s5242_s18 = sshll.u32 %s5432_s15, 4  ;;  %s5243_s18 = int_to_ptr.vmem [resolvable:$false] %s5242_s18 }
  0x85   : > { %s5244_s26 = scalar_lea.vmem %s5243_s18, 256  ;;  %p5245_p11 = scmp.lt.s32.totalorder %s495_s29, %s5243_s18 }
  0x86   : > { %p5240_p6 = pnand %p5239_p8, %p5626_p12  ;;  %p5246_p9 = scmp.lt.s32.totalorder %s5244_s26, %s5238_s6 }
  0x88   : > { %p5241_p7 = pneg %p5240_p6  ;;  %p5247_p1 = por %p5246_p9, %p5245_p11 }
  0x8a   : > { %p5248_p3 = pnand %p5247_p1, %p5241_p7 }
  0x8c   : > { %5251 = shalt.err (!%p5248_p3)
}
  0x8d   : > { %5013 = dma.hbm_to_vmem [thread:$0]  (%p5626_p12), %s5750_s12, 128, %s495_s29, %s5686_s10  }
  0x8e   : > { %s5775_s1 = scalar_lea.hbm %s6587_s3, %s5674_s27  ;;  %s505_s13 = scalar_lea.vmem [#allocation11], %s5671_s14 }
  0x8f   : > { %s512_s7 = sshll.u32 %s505_s13, 4  ;;  %s6654_s8 = sand.u32 1, %s5394_s17   ;;  %s513_s7 = int_to_ptr.vmem [resolvable:$true] %s512_s7 }
  0x90   : > { %s502_s16 = scalar_lea.sflag [#allocation12], %s6654_s8  ;;  %s5252_s6 = scalar_lea.hbm %s5775_s1, 128 }
  0x91   : > { %p5253_p4 = scmp.ne.s32.totalorder %s5775_s1, %s5252_s6  ;;  %s5256_s29 = scalar_lea.hbm %s6587_s3, 384 }
  0x92   : > { %p5257_p10 = scmp.lt.u32.totalorder %s5775_s1, %s6587_s3  ;;  %p5258_p13 = scmp.lt.u32.totalorder %s5256_s29, %s5252_s6 }
  0x93   : > { %p5254_p5 = pnand %p5253_p4, %p5626_p12  ;;  %p5260_p8 = scmp.lt.u32.totalorder %s5252_s6, %s5775_s1 }
  0x94   : > { %p5259_p0 = por %p5258_p13, %p5257_p10 }
  0x95   : > { %p5255_p2 = pneg %p5254_p5 }
  0x96   : > { %p5261_p6 = por %p5260_p8, %p5259_p0 }
  0x98   : > { %p5262_p7 = pnand %p5261_p6, %p5255_p2 }
  0x9a   : > { %5265 = shalt.err (!%p5262_p7)
}
  0x9b   : > { %s5266_s14 = scalar_lea.vmem %s513_s7, 128  ;;  %s5433_s18 = smov [#allocation11]  }
  0x9c   : > { %p5267_p11 = scmp.ne.s32.totalorder %s513_s7, %s5266_s14  ;;  %s5270_s26 = sshll.u32 %s5433_s18, 4  ;;  %s5271_s26 = int_to_ptr.vmem [resolvable:$false] %s5270_s26 }
  0x9d   : > { %s5272_s21 = scalar_lea.vmem %s5271_s26, 256  ;;  %p5273_p3 = scmp.lt.s32.totalorder %s513_s7, %s5271_s26 }
  0x9e   : > { %p5268_p9 = pnand %p5267_p11, %p5626_p12  ;;  %p5274_p4 = scmp.lt.s32.totalorder %s5272_s21, %s5266_s14 }
  0xa0   : > { %p5269_p1 = pneg %p5268_p9  ;;  %p5275_p5 = por %p5274_p4, %p5273_p3 }
  0xa2   : > { %p5276_p10 = pnand %p5275_p5, %p5269_p1 }
  0xa4   : > { %5279 = shalt.err (!%p5276_p10)
}
  0xa5   : > { %5014 = dma.hbm_to_vmem [thread:$0]  (%p5626_p12), %s5775_s1, 128, %s513_s7, %s502_s16  }
  0xa6   : > { %p6655_p2 = scmp.ne.s32.totalorder %s6647_s9, 0 }
  0xa7   : > { %s520_s28 = sand.u32 (%p6655_p2), 1, %s5382_s30   ;;  %s5009_s13 = smul.u32 (%p6655_p2), 24, %s5418_s23 }
  0xa8   : > { %518 = sbr.rel (!%p6655_p2) target bundleno = 177 (0xb1), region = 68  ;;  %s4032_s8 = sshll.u32 (%p6655_p2), %s520_s28, 6 }
  0xa9   : > { %s525_s6 = sadd.s32 (%p6655_p2), %s5422_s24, %s5009_s13  ;;  %s522_s22 = scalar_lea.vmem (%p6655_p2), [#allocation13], %s4032_s8 }
  0xaa   : > { %s4035_s10 = sshll.u32 (%p6655_p2), %s525_s6, 3 }
  0xab   : > { %s527_s27 = scalar_lea.vmem (%p6655_p2), %s6588_s4, %s4035_s10 }
  0xac   : > { %v569_v0 = vld [vmem:[%s527_s27] sm:$0xff] (%p6655_p2)  ;;  %v571_v1 = vld [vmem:[%s527_s27 + $0x18] sm:$0xff] (%p6655_p2)  ;;  %v573_v2 = vld [vmem:[%s527_s27 + $0x30] sm:$0xff] (%p6655_p2) }
  0xad   : > { %570 = vst [vmem:[%s522_s22] sm:$0xff] (%p6655_p2), %v569_v0  ;;  %572 = vst [vmem:[%s522_s22 + $0x8] sm:$0xff] (%p6655_p2), %v571_v1  ;;  %v575_v3 = vld [vmem:[%s527_s27 + $0x48] sm:$0xff] (%p6655_p2)  ;;  %v577_v4 = vld [vmem:[%s527_s27 + $0x60] sm:$0xff] (%p6655_p2) }
  0xae   : > { %574 = vst [vmem:[%s522_s22 + $0x10] sm:$0xff] (%p6655_p2), %v573_v2  ;;  %v579_v5 = vld [vmem:[%s527_s27 + $0x78] sm:$0xff] (%p6655_p2)  ;;  %576 = vst [vmem:[%s522_s22 + $0x18] sm:$0xff] (%p6655_p2), %v575_v3  ;;  %v581_v6 = vld [vmem:[%s527_s27 + $0x90] sm:$0xff] (%p6655_p2) }
  0xaf   : > { %578 = vst [vmem:[%s522_s22 + $0x20] sm:$0xff] %v577_v4  ;;  %580 = vst [vmem:[%s522_s22 + $0x28] sm:$0xff] %v579_v5  ;;  %v583_v7 = vld [vmem:[%s527_s27 + $0xa8] sm:$0xff] }
  0xb0   : > { %582 = vst [vmem:[%s522_s22 + $0x30] sm:$0xff] %v581_v6  ;;  %584 = vst [vmem:[%s522_s22 + $0x38] sm:$0xff] %v583_v7 }
  0xb1 PF: > { %p6656_p12 = scmp.ne.s32.totalorder %s6647_s9, 0 }
  0xb2   : > { %s592_s1 = sand.u32 (%p6656_p12), 1, %s5382_s30   ;;  %s5010_s7 = smul.u32 (%p6656_p12), 24, %s5418_s23 }
  0xb3   : > { %590 = sbr.rel (!%p6656_p12) target bundleno = 188 (0xbc), region = 106  ;;  %s4036_s16 = sshll.u32 (%p6656_p12), %s592_s1, 6 }
  0xb4   : > { %s597_s15 = sadd.s32 (%p6656_p12), %s5422_s24, %s5010_s7  ;;  %s594_s28 = scalar_lea.vmem (%p6656_p12), [#allocation14], %s4036_s16 }
  0xb5   : > { %s4039_s14 = sshll.u32 (%p6656_p12), %s597_s15, 3 }
  0xb6   : > { %s599_s21 = scalar_lea.vmem (%p6656_p12), %s6589_s5, %s4039_s14 }
  0xb7   : > { %v641_v8 = vld [vmem:[%s599_s21] sm:$0xff] (%p6656_p12)  ;;  %v643_v9 = vld [vmem:[%s599_s21 + $0x18] sm:$0xff] (%p6656_p12)  ;;  %v645_v10 = vld [vmem:[%s599_s21 + $0x30] sm:$0xff] (%p6656_p12) }
  0xb8   : > { %642 = vst [vmem:[%s594_s28] sm:$0xff] (%p6656_p12), %v641_v8  ;;  %644 = vst [vmem:[%s594_s28 + $0x8] sm:$0xff] (%p6656_p12), %v643_v9  ;;  %v647_v11 = vld [vmem:[%s599_s21 + $0x48] sm:$0xff] (%p6656_p12)  ;;  %v649_v12 = vld [vmem:[%s599_s21 + $0x60] sm:$0xff] (%p6656_p12) }
  0xb9   : > { %646 = vst [vmem:[%s594_s28 + $0x10] sm:$0xff] (%p6656_p12), %v645_v10  ;;  %v651_v13 = vld [vmem:[%s599_s21 + $0x78] sm:$0xff] (%p6656_p12)  ;;  %648 = vst [vmem:[%s594_s28 + $0x18] sm:$0xff] (%p6656_p12), %v647_v11  ;;  %v653_v14 = vld [vmem:[%s599_s21 + $0x90] sm:$0xff] (%p6656_p12) }
  0xba   : > { %650 = vst [vmem:[%s594_s28 + $0x20] sm:$0xff] %v649_v12  ;;  %652 = vst [vmem:[%s594_s28 + $0x28] sm:$0xff] %v651_v13  ;;  %v655_v15 = vld [vmem:[%s599_s21 + $0xa8] sm:$0xff] }
  0xbb   : > { %654 = vst [vmem:[%s594_s28 + $0x30] sm:$0xff] %v653_v14  ;;  %656 = vst [vmem:[%s594_s28 + $0x38] sm:$0xff] %v655_v15 }
  0xbc PF: > { %p4040_p13 = scmp.ge.s32.totalorder %s5426_s25, 1  ;;  %p661_p0 = scmp.lt.s32.totalorder %s5426_s25, 10 }
  0xbe   : > { %p662_p8 = pnand %p4040_p13, %p661_p0 }
  0xbf   : > { %s667_s9 = sand.u32 (!%p662_p8), 1, %s5402_s19   ;;  %p6657_p6 = scmp.ne.s32.totalorder (!%p662_p8), %s6640_s11, 0 }
  0xc0   : > { %665 = sbr.rel (%p662_p8) target bundleno = 1841 (0x731), region = 144  ;;  %s4041_s13 = sshll.u32 (!%p662_p8), %s667_s9, 3 }
  0xc1   : > { %s668_s8 = scalar_lea.sflag (!%p662_p8), [#allocation6], %s667_s9  ;;  %s5816_s6 = scalar_lea.vmem (!%p662_p8), [#allocation5], %s4041_s13 }
  0xc7   : > { %5361 = dma.done.wait (%p6657_p6), %s668_s8, 128  }
  0xc8   : > { %5363 = vsyncadd (%p6657_p6), %s668_s8, 4294967168  ;;  %s6658_s10 = sld [smem:[#allocation25_spill]]  ;;  %s6659_s12 = sld [smem:[#allocation22_spill]] }
  0xc9   : > { %s6660_s29 = sld [smem:[#allocation30_spill]] }
  0xce   : > { %s676_s27 = sand.u32 1, %s6658_s10   ;;  %s5824_s22 = sand.u32 1, %s6659_s12  }
  0xcf   : > { %s5827_s1 = sshll.u32 %s5824_s22, 3  ;;  %s677_s7 = scalar_lea.sflag [#allocation9], %s676_s27 }
  0xd0   : > { %s680_s16 = scalar_lea.vmem [#allocation8], %s5827_s1  ;;  %p6661_p7 = scmp.ne.s32.totalorder %s6660_s29, 0 }
  0xd2   : > { %5365 = dma.done.wait (%p6661_p7), %s677_s7, 256  }
  0xd3   : > { %5367 = vsyncadd (%p6661_p7), %s677_s7, 4294967040  ;;  %s689_s11 = scalar_lea.vmem [#allocation10], %s5827_s1  ;;  %s695_s15 = scalar_lea.sflag [#allocation12], %s5824_s22 }
  0xd4   : > { %5369 = dma.done.wait (%p6661_p7), %s695_s15, 128  }
  0xd5   : > { %5371 = vsyncadd (%p6661_p7), %s695_s15, 4294967168  ;;  %s6662_s18 = sld [smem:[#allocation20_spill]]  ;;  %s6663_s8 = sld [smem:[#allocation23_spill]] }
  0xdb   : > { %s704_s26 = sand.u32 1, %s6662_s18   ;;  %p4048_p11 = scmp.ne.s32.totalorder %s6663_s8, 0 }
  0xdc   : > { %s4045_s21 = sshll.u32 %s704_s26, 6  ;;  %vm787_vm0 = vcmask (!%p4048_p11), 261120   ;;  %v5434_v16 = vmov (!%p4048_p11), -1e+30   ;;  %v5435_v17 = vmov (!%p4048_p11), 0.0  }
  0xdd   : > { %s5842_s28 = scalar_lea.vmem [#allocation13], %s4045_s21  ;;  %s5844_s9 = scalar_lea.vmem [#allocation14], %s4045_s21  ;;  %788 = vst.msk [vmem:[#allocation2] sm:$0xff] (!%p4048_p11), %vm787_vm0, %v5434_v16  ;;  %789 = vst.msk [vmem:[#allocation3] sm:$0xff] (!%p4048_p11), %vm787_vm0, %v5435_v17 }
  0xde   : > { %786 = sbr.rel (%p4048_p11) target bundleno = 229 (0xe5), region = 172  ;;  %790 = vst.msk [vmem:[#allocation4] sm:$0xff] (!%p4048_p11), %vm787_vm0, %v5435_v17 }
  0xe5 PF: > { %s6664_s29 = sld [smem:[#allocation36_spill]]  ;;  %s6666_s21 = sld [smem:[#allocation37_spill]]  ;;  %vm803_vm1 = vcmask 261120   ;;  %v5436_v27 = vmov 0   ;;  %v791_v33 = vld [vmem:[%s5842_s28] sm:$0xff]  ;;  %v792_v38 = vld [vmem:[%s5842_s28 + $0x8] sm:$0xff] }
  0xe6   : > { %5139 = vset.pattern.permute.xlu1 %v5436_v27  ;;  %5138 = vset.pattern.permute.xlu0 %v5436_v27  ;;  %v805_v37 = vsel %vm803_vm1, %v791_v33, 0  ;;  %v793_v39 = vld [vmem:[%s5842_s28 + $0x10] sm:$0xff]  ;;  %v794_v40 = vld [vmem:[%s5842_s28 + $0x18] sm:$0xff]  ;;  %v808_v44 = vsel %vm803_vm1, %v792_v38, 0  ;;  %v795_v45 = vld [vmem:[%s5842_s28 + $0x20] sm:$0xff] }
  0xe7   : > { %v5909_v43 = vand.u32 4294901760, %v805_v37  ;;  %v5920_v47 = vand.u32 4294901760, %v808_v44  ;;  %v796_v50 = vld [vmem:[%s5842_s28 + $0x28] sm:$0xff]  ;;  %v811_v52 = vsel %vm803_vm1, %v793_v39, 0  ;;  %v814_v53 = vsel %vm803_vm1, %v794_v40, 0  ;;  %v798_v40 = vld [vmem:[%s5842_s28 + $0x38] sm:$0xff] }
  0xe8   : > { %v817_v54 = vsel %vm803_vm1, %v795_v45, 0  ;;  %v5942_v58 = vand.u32 4294901760, %v811_v52  ;;  %v5948_v60 = vand.u32 4294901760, %v814_v53  ;;  %v820_v62 = vsel %vm803_vm1, %v796_v50, 0 }
  0xe9   : > { %v5930_v51 = vsub.f32 %v805_v37, %v5909_v43  ;;  %v5938_v55 = vsub.f32 %v808_v44, %v5920_v47  ;;  %v5950_v61 = vand.u32 4294901760, %v817_v54  ;;  %v5974_v6 = vand.u32 4294901760, %v820_v62  ;;  %v797_v37 = vld [vmem:[%s5842_s28 + $0x30] sm:$0xff] }
  0xea   : > { %v5963_v2 = vsub.f32 %v811_v52, %v5942_v58  ;;  %v5969_v4 = vsub.f32 %v814_v53, %v5948_v60 }
  0xeb   : > { %s6665_s27 = smov %s6664_s29  ;;  %v799_v18 = vld [vmem:[%s6664_s29] sm:$0xff]  ;;  %s6667_s13 = smov %s6666_s21  ;;  %v5946_v59 = vand.u32 4294901760, %v5930_v51  ;;  %v5954_v63 = vand.u32 4294901760, %v5938_v55  ;;  %v5972_v5 = vsub.f32 %v817_v54, %v5950_v61  ;;  %v5989_v14 = vsub.f32 %v820_v62, %v5974_v6 }
  0xec   : > { %v800_v19 = vld [vmem:[%s6665_s27 + $0x8] sm:$0xff]  ;;  %v5857_v20 = vld [vmem:[%s6666_s21] sm:$0xff]  ;;  %v829_v21 = vand.u32 4294901760, %v799_v18  ;;  %v5868_v25 = vld [vmem:[%s6665_s27 + $0x10] sm:$0xff]  ;;  %v5980_v10 = vand.u32 4294901760, %v5963_v2  ;;  %v5983_v12 = vand.u32 4294901760, %v5969_v4 }
  0xed   : > { %v832_v22 = vand.u32 4294901760, %v800_v19  ;;  %v5862_v23 = vld [vmem:[%s6667_s13 + $0x8] sm:$0xff]  ;;  %v1619_v24 = vand.u32 4294901760, %v5857_v20  ;;  %v5873_v26 = vld [vmem:[%s6665_s27 + $0x18] sm:$0xff]  ;;  %v835_v29 = vand.u32 4294901760, %v5868_v25  ;;  %v5883_v31 = vld [vmem:[%s6667_s13 + $0x10] sm:$0xff]  ;;  %v900_v3 = vsub.f32 %v5930_v51, %v5946_v59 }
  0xee   : > { %v1622_v28 = vand.u32 4294901760, %v5862_v23  ;;  %v838_v30 = vand.u32 4294901760, %v5873_v26  ;;  %v5888_v32 = vld [vmem:[%s6667_s13 + $0x18] sm:$0xff]  ;;  %v1625_v35 = vand.u32 4294901760, %v5883_v31  ;;  %v5922_v48 = vsub.f32 %v799_v18, %v829_v21 }
  0xef   : > { %v5891_v34 = vpack.c.bf16 %v832_v22, %v829_v21  ;;  %v1628_v36 = vand.u32 4294901760, %v5888_v32  ;;  %v5924_v49 = vsub.f32 %v800_v19, %v832_v22  ;;  %v910_v7 = vsub.f32 %v5938_v55, %v5954_v63 }
  0xf0   : > { %v5903_v41 = vpack.c.bf16 %v1622_v28, %v1619_v24  ;;  %v5907_v42 = vpack.c.bf16 %v838_v30, %v835_v29  ;;  %v980_v56 = vand.u32 4294901760, %v5922_v48  ;;  %v901_v11 = vand.u32 4294901760, %v900_v3 }
  0xf1   : > { %4716 = vmatprep.subr.bf16.mxu0 %v5891_v34  ;;  %v5918_v46 = vpack.c.bf16 %v1628_v36, %v1625_v35  ;;  %v987_v57 = vand.u32 4294901760, %v5924_v49  ;;  %v5986_v13 = vand.u32 4294901760, %v5972_v5  ;;  %v911_v15 = vand.u32 4294901760, %v910_v7 }
  0xf2   : > { %4764 = vmatprep.subr.bf16.mxu1 %v5903_v41  ;;  %4718 = vmatpush3.bf16.msra.mxu0 %v5891_v34  ;;  %v981_v0 = vsub.f32 %v5922_v48, %v980_v56  ;;  %v920_v17 = vsub.f32 %v5963_v2, %v5980_v10  ;;  %v5994_v18 = vsub.f32 %v5868_v25, %v835_v29  ;;  %v6001_v22 = vand.u32 4294901760, %v5989_v14 }
  0xf3   : > { %4766 = vmatpush3.bf16.msra.mxu1 %v5903_v41  ;;  %4720 = vmatprep.subr.bf16.mxu0 %v5907_v42  ;;  %v988_v1 = vsub.f32 %v5924_v49, %v987_v57  ;;  %v930_v19 = vsub.f32 %v5969_v4, %v5983_v12  ;;  %v940_v21 = vsub.f32 %v5972_v5, %v5986_v13  ;;  %v826_v54 = vsel %vm803_vm1, %v798_v40, 0 }
  0xf4   : > { %4768 = vmatprep.subr.bf16.mxu1 %v5918_v46  ;;  %v982_v8 = vand.u32 4294901760, %v981_v0  ;;  %4303 = vmatprep.mubr.f32.mxu0 %v901_v11  ;;  %v6006_v33 = vsub.f32 %v5873_v26, %v838_v30  ;;  %v921_v25 = vand.u32 4294901760, %v920_v17  ;;  %v994_v29 = vand.u32 4294901760, %v5994_v18 }
  0xf5   : > { %v989_v9 = vand.u32 4294901760, %v988_v1  ;;  %4423 = vmatprep.mubr.f32.mxu1 %v901_v11  ;;  %v6013_v38 = vsub.f32 %v5857_v20, %v1619_v24  ;;  %v6018_v39 = vsub.f32 %v5862_v23, %v1622_v28  ;;  %v931_v26 = vand.u32 4294901760, %v930_v19 }
  0xf6   : > { %4722 = vmatpush3.bf16.msra.mxu0 %v5907_v42  ;;  %v941_v30 = vand.u32 4294901760, %v940_v21  ;;  %v950_v44 = vsub.f32 %v5989_v14, %v6001_v22  ;;  %v1001_v45 = vand.u32 4294901760, %v6006_v33  ;;  %v995_v20 = vsub.f32 %v5994_v18, %v994_v29  ;;  %v6063_v21 = vld [vmem:[%s5844_s9 + $0x10] sm:$0xff] }
  0xf7   : > { %4770 = vmatpush3.bf16.msra.mxu1 %v5918_v46  ;;  %v4723_v16 = vpack.c.bf16 %v989_v9, %v982_v8  ;;  %v1770_v24 = vand.u32 4294901760, %v6013_v38  ;;  %v1777_v23 = vand.u32 4294901760, %v6018_v39  ;;  %v823_v28 = vsel %vm803_vm1, %v797_v37, 0 }
  0xf8   : > { %v951_v50 = vand.u32 4294901760, %v950_v44  ;;  %v1002_v52 = vsub.f32 %v6006_v33, %v1001_v45  ;;  %v6033_v53 = vand.u32 4294901760, %v823_v28  ;;  %v996_v62 = vand.u32 4294901760, %v995_v20  ;;  %v6083_v44 = vld [vmem:[%s5844_s9] sm:$0xff] }
  0xf9   : > { %4304 = vmatmul.mubr.f32.vlgmr.msra.gmra.mrb[0].mxu0 %v911_v15  ;;  %4724 = vmatprep.subr.bf16.mxu0 %v4723_v16  ;;  %v1771_v0 = vsub.f32 %v6013_v38, %v1770_v24  ;;  %v1778_v1 = vsub.f32 %v6018_v39, %v1777_v23  ;;  %v6042_v3 = vand.u32 4294901760, %v826_v54  ;;  %v6050_v9 = vsub.f32 %v5883_v31, %v1625_v35 }
  0xfa   : > { %4424 = vmatmul.mubr.f32.vlgmr.msra.gmra.mrb[0].mxu1 %v911_v15  ;;  %4726 = vmatpush3.bf16.msra.mxu0 %v4723_v16  ;;  %v1003_v7 = vand.u32 4294901760, %v1002_v52  ;;  %v6045_v8 = vsub.f32 %v823_v28, %v6033_v53  ;;  %v6055_v11 = vsub.f32 %v5888_v32, %v1628_v36  ;;  %v4731_v19 = vpack.c.bf16 %v5924_v49, %v5922_v48 }
  0xfb   : > { %4306 = vmatprep.mubr.f32.mxu0 %v921_v25  ;;  %4426 = vmatprep.mubr.f32.mxu1 %v921_v25  ;;  %v1772_v15 = vand.u32 4294901760, %v1771_v0  ;;  %v1779_v16 = vand.u32 4294901760, %v1778_v1  ;;  %v6058_v17 = vsub.f32 %v826_v54, %v6042_v3  ;;  %v1784_v35 = vand.u32 4294901760, %v6050_v9 }
  0xfc   : > { %v4727_v37 = vpack.c.bf16 %v1003_v7, %v996_v62  ;;  %v6066_v31 = vand.u32 4294901760, %v6045_v8  ;;  %v1791_v32 = vand.u32 4294901760, %v6055_v11  ;;  %vm2488_vm2 = vcmp.gt.f32.partialorder %v6063_v21, 0.5 }
  0xfd   : > { %4307 = vmatmul.mubr.f32.gmra.mrb[2].mxu0 %v931_v26  ;;  %v4771_v36 = vpack.c.bf16 %v1779_v16, %v1772_v15  ;;  %v6071_v25 = vand.u32 4294901760, %v6058_v17  ;;  %v2496_v28 = vsel %vm2488_vm2, 1, %v5436_v27  ;;  %vm2486_vm3 = vcmp.gt.f32.partialorder %v6083_v44, 0.5 }
  0xfe   : > { %4427 = vmatmul.mubr.f32.gmra.mrb[2].mxu1 %v931_v26  ;;  %4309 = vmatprep.mubr.f32.mxu0 %v941_v30  ;;  %v960_v40 = vsub.f32 %v6045_v8, %v6066_v31  ;;  %v1785_v26 = vsub.f32 %v6050_v9, %v1784_v35  ;;  %v4779_v7 = vpack.c.bf16 %v6018_v39, %v6013_v38  ;;  %v2494_v15 = vsel %vm2486_vm3, 1, %v5436_v27  ;;  %v4051_v38 = vld [vmem:[%s5816_s6 + $0x2] ss:$0 sm:$0xff] }
  0xff   : > { %4429 = vmatprep.mubr.f32.mxu1 %v941_v30  ;;  %4728 = vmatprep.subr.bf16.mxu0 %v4727_v37  ;;  %v1792_v30 = vsub.f32 %v6055_v11, %v1791_v32  ;;  %v970_v20 = vsub.f32 %v6058_v17, %v6071_v25  ;;  %v4799_v49 = vpack.c.bf16 %v1791_v32, %v1784_v35 }
 0x100   : > { %4772 = vmatprep.subr.bf16.mxu1 %v4771_v36  ;;  %4730 = vmatpush3.bf16.msra.mxu0 %v4727_v37  ;;  %v961_v52 = vand.u32 4294901760, %v960_v40  ;;  %v1786_v54 = vand.u32 4294901760, %v1785_v26  ;;  %v4735_v37 = vpack.c.bf16 %v6006_v33, %v5994_v18  ;;  %v2405_v40 = vld [vmem:[%s5844_s9 + $0x8] sm:$0xff] }
 0x101   : > { %4310 = vmatmul.mubr.f32.gmra.mrb[4].mxu0 %v951_v50  ;;  %4774 = vmatpush3.bf16.msra.mxu1 %v4771_v36  ;;  %v1793_v62 = vand.u32 4294901760, %v1792_v30  ;;  %v971_v0 = vand.u32 4294901760, %v970_v20  ;;  %v4783_v36 = vpack.c.bf16 %v6055_v11, %v6050_v9  ;;  %v6109_v26 = vld [vmem:[%s5844_s9 + $0x28] sm:$0xff]  ;;  %vm2487_vm5 = vcmp.gt.f32.partialorder %v2405_v40, 0.5  ;;  %v6120_v30 = vld [vmem:[%s5844_s9 + $0x38] sm:$0xff] }
 0x102   : > { %4430 = vmatmul.mubr.f32.gmra.mrb[4].mxu1 %v951_v50  ;;  %v6089_v50 = vld [vmem:[%s5844_s9 + $0x18] sm:$0xff]  ;;  %4732 = vmatprep.subr.bf16.mxu0 %v4731_v19  ;;  %vm2491_vm6 = vcmp.gt.f32.partialorder %v6109_v26, 0.5  ;;  %v2495_v20 = vsel %vm2487_vm5, 1, %v5436_v27  ;;  %vm2493_vm8 = vcmp.gt.f32.partialorder %v6120_v30, 0.5  ;;  %v4052_v18 = vld [vmem:[%s5816_s6 + $0x3] ss:$0 sm:$0xff] }
 0x103   : > { %2509 = vperm.xlu1 %5139, %v2496_v28   ;;  %4312 = vmatprep.mubr.f32.mxu0 %v961_v52  ;;  %v4775_v1 = vpack.c.bf16 %v1793_v62, %v1786_v54  ;;  %vm2489_vm4 = vcmp.gt.f32.partialorder %v6089_v50, 0.5  ;;  %v2499_v28 = vsel %vm2491_vm6, 1, %v5436_v27  ;;  %v2501_v54 = vsel %vm2493_vm8, 1, %v5436_v27  ;;  %v6142_v62 = vld [vmem:[%s5844_s9 + $0x30] sm:$0xff] }
 0x104   : > { %4432 = vmatprep.mubr.f32.mxu1 %v961_v52  ;;  %v2497_v16 = vsel %vm2489_vm4, 1, %v5436_v27  ;;  %2503 = vperm.xlu0 %5138, %v2494_v15   ;;  %vm2492_vm9 = vcmp.gt.f32.partialorder %v6142_v62, 0.5 }
 0x105   : > { %4313 = vmatmul.mubr.f32.gmra.mrb[6].mxu0 %v971_v0  ;;  %4776 = vmatprep.subr.bf16.mxu1 %v4775_v1  ;;  %v2500_v48 = vsel %vm2492_vm9, 1, %v5436_v27 }
 0x106   : > { %4433 = vmatmul.mubr.f32.gmra.mrb[6].mxu1 %v971_v0  ;;  %4323 = vmatprep.mubr.f32.mxu0 %v5909_v43 }
 0x107   : > { %4778 = vmatpush3.bf16.msra.mxu1 %v4775_v1  ;;  %4443 = vmatprep.mubr.f32.mxu1 %v5909_v43 }
 0x108   : > { %4780 = vmatprep.subr.bf16.mxu1 %v4779_v7  ;;  %2512 = vperm.xlu1 %5139, %v2497_v16  }
 0x109   : > { %4324 = vmatmul.mubr.f32.vlgmr.msra.gmra.mrb[0].mxu0 %v5920_v47  ;;  %2506 = vperm.xlu0 %5138, %v2495_v20  }
 0x10a   : > { %4444 = vmatmul.mubr.f32.vlgmr.msra.gmra.mrb[0].mxu1 %v5920_v47  ;;  %4734 = vmatpush3.bf16.msra.mxu0 %v4731_v19  ;;  %v6116_v19 = vld [vmem:[%s5844_s9 + $0x20] sm:$0xff] }
 0x10b   : > { %4326 = vmatprep.mubr.f32.mxu0 %v5942_v58  ;;  %4446 = vmatprep.mubr.f32.mxu1 %v5942_v58  ;;  %vm2490_vm7 = vcmp.gt.f32.partialorder %v6116_v19, 0.5 }
 0x10c   : > { %4736 = vmatprep.subr.bf16.mxu0 %v4735_v37  ;;  %4782 = vmatpush3.bf16.msra.mxu1 %v4779_v7  ;;  %v2498_v52 = vsel %vm2490_vm7, 1, %v5436_v27  ;;  %v4751_v27 = vpack.c.bf16 %v1001_v45, %v994_v29  ;;  %v4054_v29 = vld [vmem:[%s5816_s6 + $0x5] ss:$0 sm:$0xff] }
 0x10d   : > { %4327 = vmatmul.mubr.f32.gmra.mrb[2].mxu0 %v5948_v60  ;;  %4784 = vmatprep.subr.bf16.mxu1 %v4783_v36 }
 0x10e   : > { %4447 = vmatmul.mubr.f32.gmra.mrb[2].mxu1 %v5948_v60  ;;  %4329 = vmatprep.mubr.f32.mxu0 %v5950_v61 }
 0x10f   : > { %4449 = vmatprep.mubr.f32.mxu1 %v5950_v61  ;;  %4738 = vmatpush3.bf16.msra.mxu0 %v4735_v37 }
 0x110   : > { %4786 = vmatpush3.bf16.msra.mxu1 %v4783_v36  ;;  %4740 = vmatprep.subr.bf16.mxu0 %v5891_v34 }
 0x111   : > { %4330 = vmatmul.mubr.f32.gmra.mrb[4].mxu0 %v5974_v6  ;;  %4788 = vmatprep.subr.bf16.mxu1 %v5903_v41 }
 0x112   : > { %4450 = vmatmul.mubr.f32.gmra.mrb[4].mxu1 %v5974_v6  ;;  %4332 = vmatprep.mubr.f32.mxu0 %v6033_v53 }
 0x113   : > { %4452 = vmatprep.mubr.f32.mxu1 %v6033_v53  ;;  %2518 = vperm.xlu1 %5139, %v2499_v28  }
 0x114   : > { %2515 = vperm.xlu0 %5138, %v2498_v52  }
 0x115   : > { %4333 = vmatmul.mubr.f32.gmra.mrb[6].mxu0 %v6042_v3 }
 0x116   : > { %4453 = vmatmul.mubr.f32.gmra.mrb[6].mxu1 %v6042_v3  ;;  %4343 = vmatprep.mubr.f32.mxu0 %v5930_v51 }
 0x117   : > { %4463 = vmatprep.mubr.f32.mxu1 %v5930_v51  ;;  %2524 = vperm.xlu1 %5139, %v2501_v54   ;;  %v4747_v51 = vpack.c.bf16 %v987_v57, %v980_v56 }
 0x118   : > { %2521 = vperm.xlu0 %5138, %v2500_v48  }
 0x119   : > { %4344 = vmatmul.mubr.f32.vlgmr.msra.gmra.mrb[0].mxu0 %v5938_v55 }
 0x11a   : > { %4464 = vmatmul.mubr.f32.vlgmr.msra.gmra.mrb[0].mxu1 %v5938_v55  ;;  %4742 = vmatpush3.bf16.msra.mxu0 %v5891_v34  ;;  %v4795_v55 = vpack.c.bf16 %v1777_v23, %v1770_v24  ;;  %v4053_v23 = vld [vmem:[%s5816_s6 + $0x4] ss:$0 sm:$0xff] }
 0x11b   : > { %4346 = vmatprep.mubr.f32.mxu0 %v5963_v2  ;;  %4466 = vmatprep.mubr.f32.mxu1 %v5963_v2 }
 0x11c   : > { %4744 = vmatprep.subr.bf16.mxu0 %v5907_v42  ;;  %4790 = vmatpush3.bf16.msra.mxu1 %v5903_v41 }
 0x11d   : > { %4347 = vmatmul.mubr.f32.gmra.mrb[2].mxu0 %v5969_v4  ;;  %4792 = vmatprep.subr.bf16.mxu1 %v5918_v46 }
 0x11e   : > { %4467 = vmatmul.mubr.f32.gmra.mrb[2].mxu1 %v5969_v4  ;;  %4349 = vmatprep.mubr.f32.mxu0 %v5972_v5 }
 0x11f   : > { %4469 = vmatprep.mubr.f32.mxu1 %v5972_v5  ;;  %4746 = vmatpush3.bf16.msra.mxu0 %v5907_v42 }
 0x120   : > { %4794 = vmatpush3.bf16.msra.mxu1 %v5918_v46  ;;  %4748 = vmatprep.subr.bf16.mxu0 %v4747_v51 }
 0x121   : > { %4350 = vmatmul.mubr.f32.gmra.mrb[4].mxu0 %v5989_v14  ;;  %4796 = vmatprep.subr.bf16.mxu1 %v4795_v55 }
 0x122   : > { %4470 = vmatmul.mubr.f32.gmra.mrb[4].mxu1 %v5989_v14  ;;  %4352 = vmatprep.mubr.f32.mxu0 %v6045_v8 }
 0x123   : > { %4472 = vmatprep.mubr.f32.mxu1 %v6045_v8  ;;  %2593 = vperm.xlu1 %5139, %v2405_v40  }
 0x124   : > { %2588 = vperm.xlu0 %5138, %v6083_v44   ;;  %v4055_v44 = vld [vmem:[%s5816_s6 + $0x6] ss:$0 sm:$0xff] }
 0x125   : > { %4353 = vmatmul.mubr.f32.gmra.mrb[6].mxu0 %v6058_v17 }
 0x126   : > { %4473 = vmatmul.mubr.f32.gmra.mrb[6].mxu1 %v6058_v17  ;;  %4363 = vmatprep.mubr.f32.mxu0 %v5946_v59 }
 0x127   : > { %4483 = vmatprep.mubr.f32.mxu1 %v5946_v59  ;;  %2603 = vperm.xlu1 %5139, %v6089_v50   ;;  %v4050_v59 = vld [vmem:[%s5816_s6 + $0x1] ss:$0 sm:$0xff] }
 0x128   : > { %2598 = vperm.xlu0 %5138, %v6063_v21  }
 0x129   : > { %4364 = vmatmul.mubr.f32.vlgmr.msra.gmra.mrb[0].mxu0 %v5954_v63 }
 0x12a   : > { %4484 = vmatmul.mubr.f32.vlgmr.msra.gmra.mrb[0].mxu1 %v5954_v63  ;;  %4750 = vmatpush3.bf16.msra.mxu0 %v4747_v51  ;;  %v4049_v63 = vld [vmem:[%s5816_s6] ss:$0 sm:$0xff] }
 0x12b   : > { %4366 = vmatprep.mubr.f32.mxu0 %v5980_v10  ;;  %4486 = vmatprep.mubr.f32.mxu1 %v5980_v10 }
 0x12c   : > { %4752 = vmatprep.subr.bf16.mxu0 %v4751_v27  ;;  %4798 = vmatpush3.bf16.msra.mxu1 %v4795_v55 }
 0x12d   : > { %4367 = vmatmul.mubr.f32.gmra.mrb[2].mxu0 %v5983_v12  ;;  %4800 = vmatprep.subr.bf16.mxu1 %v4799_v49 }
 0x12e   : > { %4487 = vmatmul.mubr.f32.gmra.mrb[2].mxu1 %v5983_v12  ;;  %4369 = vmatprep.mubr.f32.mxu0 %v5986_v13 }
 0x12f   : > { %4489 = vmatprep.mubr.f32.mxu1 %v5986_v13  ;;  %4754 = vmatpush3.bf16.msra.mxu0 %v4751_v27 }
 0x130   : > { %4802 = vmatpush3.bf16.msra.mxu1 %v4799_v49  ;;  %4756 = vmatprep.subr.bf16.mxu0 %v5891_v34 }
 0x131   : > { %4370 = vmatmul.mubr.f32.gmra.mrb[4].mxu0 %v6001_v22  ;;  %4804 = vmatprep.subr.bf16.mxu1 %v5903_v41 }
 0x132   : > { %4490 = vmatmul.mubr.f32.gmra.mrb[4].mxu1 %v6001_v22  ;;  %4372 = vmatprep.mubr.f32.mxu0 %v6066_v31 }
 0x133   : > { %4492 = vmatprep.mubr.f32.mxu1 %v6066_v31  ;;  %2613 = vperm.xlu1 %5139, %v6109_v26  }
 0x134   : > { %2608 = vperm.xlu0 %5138, %v6116_v19  }
 0x135   : > { %4373 = vmatmul.mubr.f32.gmra.mrb[6].mxu0 %v6071_v25 }
 0x136   : > { %4493 = vmatmul.mubr.f32.gmra.mrb[6].mxu1 %v6071_v25  ;;  %4383 = vmatprep.mubr.f32.mxu0 %v5909_v43  ;;  %v4056_v25 = vld [vmem:[%s5816_s6 + $0x7] ss:$0 sm:$0xff]  ;;  %s6668_s6 = sld [smem:[#allocation23_spill]] }
 0x137   : > { %4503 = vmatprep.mubr.f32.mxu1 %v5909_v43  ;;  %2623 = vperm.xlu1 %5139, %v6120_v30  }
 0x138   : > { %2618 = vperm.xlu0 %5138, %v6142_v62  }
 0x139   : > { %4384 = vmatmul.mubr.f32.vlgmr.msra.gmra.mrb[0].mxu0 %v5920_v47 }
 0x13a   : > { %4504 = vmatmul.mubr.f32.vlgmr.msra.gmra.mrb[0].mxu1 %v5920_v47  ;;  %4758 = vmatpush3.bf16.msra.mxu0 %v5891_v34 }
 0x13b   : > { %4386 = vmatprep.mubr.f32.mxu0 %v5942_v58  ;;  %4506 = vmatprep.mubr.f32.mxu1 %v5942_v58 }
 0x13c   : > { %4760 = vmatprep.subr.bf16.mxu0 %v5907_v42  ;;  %4806 = vmatpush3.bf16.msra.mxu1 %v5903_v41  ;;  %p4057_p9 = scmp.ne.s32.totalorder %s6668_s6, 2 }
 0x13d   : > { %4387 = vmatmul.mubr.f32.gmra.mrb[2].mxu0 %v5948_v60  ;;  %4808 = vmatprep.subr.bf16.mxu1 %v5918_v46  ;;  %s6670_s9 = sld [smem:[#allocation40_spill]] (!%p4057_p9)  ;;  %vm5438_vm4 = vmmov (!%p4057_p9), 0   ;;  %s6671_s18 = sld [smem:[#allocation38_spill]] (!%p4057_p9)  ;;  %vm3253_vm7 = vcmask (!%p4057_p9), 523264  }
 0x13e   : > { %4507 = vmatmul.mubr.f32.gmra.mrb[2].mxu1 %v5948_v60  ;;  %4389 = vmatprep.mubr.f32.mxu0 %v5950_v61  ;;  %s6673_s21 = sld [smem:[#allocation42_spill]] (!%p4057_p9)  ;;  %s6675_s7 = sld [smem:[#allocation41_spill]] (!%p4057_p9) }
 0x13f   : > { %4509 = vmatprep.mubr.f32.mxu1 %v5950_v61  ;;  %4762 = vmatpush3.bf16.msra.mxu0 %v5907_v42  ;;  %v2420_v42 = vld [vmem:[%s680_s16] sm:$0xff]  ;;  %s6669_s16 = scalar_lea.vmem (!%p4057_p9), [#allocation11], %s5827_s1  ;;  %s6677_s26 = scalar_lea.vmem (!%p4057_p9), [#allocation15], %s5827_s1 }
 0x140   : > { %4810 = vmatpush3.bf16.msra.mxu1 %v5918_v46 }
 0x141   : > { %4390 = vmatmul.mubr.f32.gmra.mrb[4].mxu0 %v5974_v6 }
 0x142   : > { %4510 = vmatmul.mubr.f32.gmra.mrb[4].mxu1 %v5974_v6  ;;  %4392 = vmatprep.mubr.f32.mxu0 %v6033_v53 }
 0x143   : > { %4512 = vmatprep.mubr.f32.mxu1 %v6033_v53 }
 0x144   : > { %s6674_s8 = smov (!%p4057_p9), %s6673_s21 }
 0x145   : > { %4393 = vmatmul.mubr.f32.gmra.mrb[6].mxu0 %v6042_v3 }
 0x146   : > { %4513 = vmatmul.mubr.f32.gmra.mrb[6].mxu1 %v6042_v3  ;;  %4403 = vmatprep.mubr.f32.mxu0 %v5909_v43 }
 0x147   : > { %4523 = vmatprep.mubr.f32.mxu1 %v5909_v43 }
 0x149   : > { %4404 = vmatmul.mubr.f32.vlgmr.msra.gmra.mrb[0].mxu0 %v5920_v47 }
 0x14a   : > { %4524 = vmatmul.mubr.f32.vlgmr.msra.gmra.mrb[0].mxu1 %v5920_v47  ;;  %4406 = vmatprep.mubr.f32.mxu0 %v5942_v58 }
 0x14b   : > { %4526 = vmatprep.mubr.f32.mxu1 %v5942_v58 }
 0x14d   : > { %4407 = vmatmul.mubr.f32.gmra.mrb[2].mxu0 %v5948_v60 }
 0x14e   : > { %4527 = vmatmul.mubr.f32.gmra.mrb[2].mxu1 %v5948_v60  ;;  %4409 = vmatprep.mubr.f32.mxu0 %v5950_v61 }
 0x14f   : > { %4529 = vmatprep.mubr.f32.mxu1 %v5950_v61 }
 0x151   : > { %4410 = vmatmul.mubr.f32.gmra.mrb[4].mxu0 %v5974_v6 }
 0x152   : > { %4530 = vmatmul.mubr.f32.gmra.mrb[4].mxu1 %v5974_v6  ;;  %4412 = vmatprep.mubr.f32.mxu0 %v6033_v53 }
 0x153   : > { %4532 = vmatprep.mubr.f32.mxu1 %v6033_v53 }
 0x155   : > { %4413 = vmatmul.mubr.f32.gmra.mrb[6].mxu0 %v6042_v3 }
 0x156   : > { %4533 = vmatmul.mubr.f32.gmra.mrb[6].mxu1 %v6042_v3 }
 0x182   : > { %v6242_v34 = vpop.permute.xlu1 %2509 }
 0x183   : > { %v2504_v41 = vpop.permute.xlu0 %2503  ;;  %vm2528_vm12 = vcmp.eq.s32.totalorder %v6242_v34, 1 }
 0x184   : > { %vm2526_vm11 = vcmp.eq.s32.totalorder %v2504_v41, 1 }
 0x187   : > { %v2513_v56 = vpop.permute.xlu1 %2512 }
 0x188   : > { %v2507_v61 = vpop.permute.xlu0 %2506  ;;  %vm2529_vm13 = vcmp.eq.s32.totalorder %v2513_v56, 1 }
 0x189   : > { %vm2527_vm10 = vcmp.eq.s32.totalorder %v2507_v61, 1 }
 0x192   : > { %v2519_v14 = vpop.permute.xlu1 %2518 }
 0x193   : > { %v2516_v53 = vpop.permute.xlu0 %2515  ;;  %vm2531_vm14 = vcmp.eq.s32.totalorder %v2519_v14, 1 }
 0x194   : > { %vm2530_vm15 = vcmp.eq.s32.totalorder %v2516_v53, 1 }
 0x196   : > { %v2525_v19 = vpop.permute.xlu1 %2524 }
 0x197   : > { %vm2533_vm0 = vcmp.eq.s32.totalorder %v2525_v19, 1  ;;  %v2522_v54 = vpop.permute.xlu0 %2521 }
 0x198   : > { %vm2532_vm2 = vcmp.eq.s32.totalorder %v2522_v54, 1 }
 0x1a3   : > { %v2589_v61 = vpop.permute.xlu0 %2588 }
 0x21c   : > { %v4405_v43 = vpop.f32.mrb[0].mxu0 }
 0x21d   : > { %v6246_v46 = vpop.f32.mrb[0].mxu1  ;;  %v1568_v47 = vpop.f32.mrb[1].mxu0  ;;  %v2423_v57 = vadd.f32 %v4405_v43, %v2420_v42 }
 0x21e   : > { %v6248_v58 = vpop.f32.mrb[1].mxu1  ;;  %v2422_v60 = vadd.f32 %v2420_v42, %v1568_v47 }
 0x21f   : > { %v2479_v6 = vmul.f32 %v4050_v59, %v2423_v57 }
 0x220   : > { %v4408_v2 = vpop.f32.mrb[2].mxu0  ;;  %v2478_v12 = vmul.f32 %v4049_v63, %v2422_v60  ;;  %v2542_v60 = vld [vmem:[#allocation2] sm:$0xff] }
 0x221   : > { %v6252_v4 = vpop.f32.mrb[2].mxu1  ;;  %v1580_v5 = vpop.f32.mrb[3].mxu0  ;;  %v2425_v13 = vadd.f32 %v4408_v2, %v2420_v42  ;;  %v2535_v3 = vsel %vm2527_vm10, %v2479_v6, -1e+30 }
 0x222   : > { %v6254_v10 = vpop.f32.mrb[3].mxu1  ;;  %v2424_v22 = vadd.f32 %v2420_v42, %v1580_v5  ;;  %v2534_v11 = vsel %vm2526_vm11, %v2478_v12, -1e+30  ;;  %v2544_v50 = vsel %vm803_vm1, %v2535_v3, -inf }
 0x223   : > { %v2481_v17 = vmul.f32 %v4052_v18, %v2425_v13  ;;  %v2543_v16 = vsel %vm803_vm1, %v2534_v11, -inf }
 0x224   : > { %v4411_v33 = vpop.f32.mrb[4].mxu0  ;;  %v2480_v31 = vmul.f32 %v4051_v38, %v2424_v22  ;;  %v2599_v38 = vpop.permute.xlu0 %2598 }
 0x225   : > { %v2427_v39 = vadd.f32 %v4411_v33, %v2420_v42  ;;  %v6259_v45 = vpop.f32.mrb[4].mxu1  ;;  %v1592_v24 = vpop.f32.mrb[5].mxu0  ;;  %v2537_v30 = vsel %vm2529_vm13, %v2481_v17, -1e+30 }
 0x226   : > { %v2426_v8 = vadd.f32 %v2420_v42, %v1592_v24  ;;  %v6264_v9 = vpop.f32.mrb[5].mxu1  ;;  %v2536_v62 = vsel %vm2528_vm12, %v2480_v31, -1e+30  ;;  %v2546_v27 = vsel %vm803_vm1, %v2537_v30, -inf  ;;  %v2594_v24 = vpop.permute.xlu1 %2593 }
 0x227   : > { %v2483_v21 = vmul.f32 %v4054_v29, %v2427_v39  ;;  %v2545_v43 = vsel %vm803_vm1, %v2536_v62, -inf }
 0x228   : > { %v2482_v35 = vmul.f32 %v4053_v23, %v2426_v8  ;;  %v4414_v32 = vpop.f32.mrb[6].mxu0 }
 0x229   : > { %v2539_v0 = vsel %vm2531_vm14, %v2483_v21, -1e+30  ;;  %v2429_v1 = vadd.f32 %v4414_v32, %v2420_v42  ;;  %v6270_v7 = vpop.f32.mrb[6].mxu1  ;;  %v1604_v15 = vpop.f32.mrb[7].mxu0 }
 0x22a   : > { %v2549_v37 = vsel %vm803_vm1, %v2539_v0, -inf  ;;  %v2538_v36 = vsel %vm2530_vm15, %v2482_v35, -1e+30  ;;  %v2428_v40 = vadd.f32 %v2420_v42, %v1604_v15  ;;  %v6274_v26 = vpop.f32.mrb[7].mxu1  ;;  %v2604_v21 = vpop.permute.xlu1 %2603  ;;  %v2421_v35 = vld [vmem:[%s689_s11] sm:$0xff] }
 0x22b   : > { %v2550_v20 = vmax.f32 %v2544_v50, %v2549_v37  ;;  %v2547_v28 = vsel %vm803_vm1, %v2538_v36, -inf  ;;  %v2485_v52 = vmul.f32 %v4056_v25, %v2429_v1  ;;  %v2661_v15 = vadd.f32 %v2421_v35, %v6274_v26 }
 0x22c   : > { %v2548_v51 = vmax.f32 %v2543_v16, %v2547_v28  ;;  %v2484_v55 = vmul.f32 %v4055_v44, %v2428_v40  ;;  %v2656_v37 = vadd.f32 %v6246_v46, %v2421_v35 }
 0x22d   : > { %v2541_v48 = vsel %vm2533_vm0, %v2485_v52, -1e+30 }
 0x22e   : > { %v2555_v49 = vmax.f32 %v2548_v51, %v2550_v20  ;;  %v2553_v41 = vsel %vm803_vm1, %v2541_v48, -inf  ;;  %v2540_v42 = vsel %vm2532_vm2, %v2484_v55, -1e+30  ;;  %v2614_v50 = vpop.permute.xlu1 %2613  ;;  %v2657_v20 = vadd.f32 %v2421_v35, %v6254_v10 }
 0x22f   : > { %v2554_v47 = vmax.f32 %v2546_v27, %v2553_v41  ;;  %v2551_v56 = vsel %vm803_vm1, %v2540_v42, -inf }
 0x230   : > { %v2552_v57 = vmax.f32 %v2545_v43, %v2551_v56 }
 0x232   : > { %v2556_v59 = vmax.f32 %v2552_v57, %v2554_v47  ;;  %v2624_v47 = vpop.permute.xlu1 %2623 }
 0x234   : > { %v2557_v34 = vmax.f32 %v2555_v49, %v2556_v59 }
 0x236   : > { %v2558_v63 = vmax.f32 %v2542_v60, %v2557_v34 }
 0x238   : > { %v2568_v2 = vsub.f32 %v2540_v42, %v2558_v63  ;;  %2688 = vst.msk [vmem:[#allocation2] sm:$0xff] %vm803_vm1, %v2558_v63  ;;  %v2562_v5 = vsub.f32 %v2534_v11, %v2558_v63  ;;  %v2563_v6 = vsub.f32 %v2535_v3, %v2558_v63  ;;  %v2564_v12 = vsub.f32 %v2536_v62, %v2558_v63  ;;  %v2609_v11 = vpop.permute.xlu0 %2608 }
 0x239   : > { %v2565_v13 = vsub.f32 %v2537_v30, %v2558_v63  ;;  %v2566_v14 = vsub.f32 %v2538_v36, %v2558_v63  ;;  %v2567_v18 = vsub.f32 %v2539_v0, %v2558_v63  ;;  %v2569_v33 = vsub.f32 %v2541_v48, %v2558_v63 }
 0x23a   : > { %v2582_v22 = vmul.f32 1.442695, %v2568_v2  ;;  %v2570_v29 = vmul.f32 1.442695, %v2562_v5  ;;  %v2572_v39 = vmul.f32 1.442695, %v2563_v6  ;;  %v2559_v31 = vsub.f32 %v2542_v60, %v2558_v63 }
 0x23b   : > { %v2574_v23 = vmul.f32 1.442695, %v2564_v12  ;;  %v2576_v53 = vmul.f32 1.442695, %v2565_v13  ;;  %v2578_v8 = vmul.f32 1.442695, %v2566_v14  ;;  %v2655_v36 = vadd.f32 %v2421_v35, %v6248_v58 }
 0x23c   : > { %5140 = vpow2.f32 %v2582_v22  ;;  %v2580_v17 = vmul.f32 1.442695, %v2567_v18  ;;  %v2584_v3 = vmul.f32 1.442695, %v2569_v33  ;;  %v2619_v25 = vpop.permute.xlu0 %2618  ;;  %v2560_v0 = vmul.f32 1.442695, %v2559_v31 }
 0x23d   : > { %5142 = vpow2.f32 %v2570_v29  ;;  %v2658_v30 = vadd.f32 %v6252_v4, %v2421_v35  ;;  %v2660_v62 = vadd.f32 %v6259_v45, %v2421_v35  ;;  %v2659_v4 = vadd.f32 %v2421_v35, %v6264_v9 }
 0x23e   : > { %5144 = vpow2.f32 %v2572_v39  ;;  %v2662_v60 = vadd.f32 %v6270_v7, %v2421_v35 }
 0x23f   : > { %5146 = vpow2.f32 %v2574_v23  ;;  %v2634_v23 = vld [vmem:[#allocation3] sm:$0xff] }
 0x240   : > { %5148 = vpow2.f32 %v2576_v53 }
 0x241   : > { %5150 = vpow2.f32 %v2578_v8 }
 0x242   : > { %5152 = vpow2.f32 %v2580_v17 }
 0x243   : > { %5154 = vpow2.f32 %v2584_v3 }
 0x244   : > { %5156 = vpow2.f32 %v2560_v0 }
 0x246   : > { %v5141_v32 = vpop.eup %5140 }
 0x247   : > { %v5143_v44 = vpop.eup %5142  ;;  %v2632_v1 = vmul.f32 %v5141_v32, %v2619_v25  ;;  %v2653_v25 = vld [vmem:[#allocation4] sm:$0xff] }
 0x248   : > { %v5145_v16 = vpop.eup %5144  ;;  %v2626_v40 = vmul.f32 %v5143_v44, %v2589_v61 }
 0x249   : > { %v5147_v19 = vpop.eup %5146  ;;  %v2627_v28 = vmul.f32 %v5145_v16, %v2594_v24  ;;  %v2669_v52 = vmul.f32 %v2661_v15, %v2632_v1  ;;  %v2647_v53 = vsel %vm803_vm1, %v2632_v1, 0.0 }
 0x24a   : > { %v5149_v54 = vpop.eup %5148  ;;  %v2628_v51 = vmul.f32 %v5147_v19, %v2599_v38  ;;  %v2636_v55 = vsel %vm803_vm1, %v2626_v40, 0.0  ;;  %v2663_v26 = vmul.f32 %v2655_v36, %v2626_v40 }
 0x24b   : > { %v5151_v48 = vpop.eup %5150  ;;  %v2629_v46 = vmul.f32 %v5149_v54, %v2604_v21  ;;  %v2637_v58 = vsel %vm803_vm1, %v2627_v28, 0.0  ;;  %v2664_v27 = vmul.f32 %v2656_v37, %v2627_v28  ;;  %v2682_v44 = vsel %vm803_vm1, %v2669_v52, 0.0 }
 0x24c   : > { %v5153_v49 = vpop.eup %5152  ;;  %v2630_v41 = vmul.f32 %v5151_v48, %v2609_v11  ;;  %v2638_v10 = vadd.f32 %v2637_v58, %v2636_v55  ;;  %v2665_v42 = vmul.f32 %v2657_v20, %v2628_v51  ;;  %v2639_v45 = vsel %vm803_vm1, %v2628_v51, 0.0  ;;  %v2696_v20 = vld [vmem:[%s6669_s16] sm:$0xff] (!%p4057_p9)  ;;  %s6672_s16 = sld [smem:[#allocation39_spill]] (!%p4057_p9) }
 0x24d   : > { %v5155_v43 = vpop.eup %5154  ;;  %v2631_v56 = vmul.f32 %v5153_v49, %v2614_v50  ;;  %v2666_v57 = vmul.f32 %v2658_v30, %v2629_v46  ;;  %v2671_v59 = vsel %vm803_vm1, %v2663_v26, 0.0  ;;  %v2641_v2 = vsel %vm803_vm1, %v2629_v46, 0.0  ;;  %v2738_v46 = vld [vmem:[%s6670_s9] sm:$0xff] (!%p4057_p9)  ;;  %v2739_v58 = vld [vmem:[%s6670_s9 + $0x8] sm:$0xff] (!%p4057_p9) }
 0x24e   : > { %v2633_v34 = vmul.f32 %v5155_v43, %v2624_v47  ;;  %v2640_v61 = vadd.f32 %v2639_v45, %v2638_v10  ;;  %v2667_v63 = vmul.f32 %v2659_v4, %v2630_v41  ;;  %v2672_v9 = vsel %vm803_vm1, %v2664_v27, 0.0  ;;  %v5157_v24 = vpop.eup %5156  ;;  %v2740_v27 = vld [vmem:[%s6670_s9 + $0x10] sm:$0xff] (!%p4057_p9)  ;;  %v2741_v10 = vld [vmem:[%s6670_s9 + $0x18] sm:$0xff] (!%p4057_p9) }
 0x24f   : > { %v2668_v5 = vmul.f32 %v2660_v62, %v2631_v56  ;;  %v2673_v13 = vadd.f32 %v2672_v9, %v2671_v59  ;;  %v2643_v14 = vsel %vm803_vm1, %v2630_v41, 0.0  ;;  %v2674_v18 = vsel %vm803_vm1, %v2665_v42, 0.0 }
 0x250   : > { %v2642_v6 = vadd.f32 %v2641_v2, %v2640_v61  ;;  %v2670_v12 = vmul.f32 %v2662_v60, %v2633_v34  ;;  %v2645_v29 = vsel %vm803_vm1, %v2631_v56, 0.0  ;;  %v2676_v7 = vsel %vm803_vm1, %v2666_v57, 0.0 }
 0x251   : > { %v2675_v33 = vadd.f32 %v2674_v18, %v2673_v13  ;;  %v2678_v8 = vsel %vm803_vm1, %v2667_v63, 0.0  ;;  %v2649_v11 = vsel %vm803_vm1, %v2633_v34, 0.0  ;;  %v2680_v21 = vsel %vm803_vm1, %v2668_v5, 0.0 }
 0x252   : > { %v2644_v22 = vadd.f32 %v2643_v14, %v2642_v6  ;;  %v2635_v31 = vmul.f32 %v5157_v24, %v2634_v23  ;;  %v2684_v15 = vsel %vm803_vm1, %v2670_v12, 0.0  ;;  %v2654_v1 = vmul.f32 %v5157_v24, %v2653_v25  ;;  %v6347_v25 = vld [vmem:[%s6671_s18] ss:$0 sm:$0xff] (!%p4057_p9)  ;;  %s6676_s18 = sld [smem:[#allocation43_spill]] (!%p4057_p9) }
 0x253   : > { %v2677_v39 = vadd.f32 %v2676_v7, %v2675_v33  ;;  %v5437_v49 = vmov (!%p4057_p9), 0.0|0.0   ;;  %v2753_v4 = vand.u32 (!%p4057_p9), 4294901760, %v2738_v46  ;;  %v2756_v41 = vand.u32 (!%p4057_p9), 4294901760, %v2739_v58 }
 0x254   : > { %v2646_v38 = vadd.f32 %v2645_v29, %v2644_v22  ;;  %4817 = vmatprep.subr.bf16.mxu0 (!%p4057_p9), %v5437_v49  ;;  %v2759_v42 = vand.u32 (!%p4057_p9), 4294901760, %v2740_v27  ;;  %v5439_v43 = vmov (!%p4057_p9), 0.0   ;;  %v2762_v47 = vand.u32 (!%p4057_p9), 4294901760, %v2741_v10  ;;  %4811 = vmatprep.subr.bf16.mxu1 (!%p4057_p9), %v5437_v49 }
 0x255   : > { %v2679_v3 = vadd.f32 %v2678_v8, %v2677_v39  ;;  %4554 = vmatprep.mubr.msk.f32.mxu0 (!%p4057_p9), %vm5438_vm4, %v5439_v43  ;;  %4543 = vmatprep.mubr.msk.f32.mxu1 (!%p4057_p9), %vm5438_vm4, %v5439_v43  ;;  %v2833_v56 = vsub.f32 (!%p4057_p9), %v2738_v46, %v2753_v4  ;;  %v2840_v45 = vsub.f32 (!%p4057_p9), %v2739_v58, %v2756_v41 }
 0x256   : > { %v2648_v17 = vadd.f32 %v2647_v53, %v2646_v38  ;;  %v2847_v57 = vsub.f32 (!%p4057_p9), %v2740_v27, %v2759_v42  ;;  %v2854_v59 = vsub.f32 (!%p4057_p9), %v2741_v10, %v2762_v47  ;;  %v4812_v7 = vpack.c.bf16 (!%p4057_p9), %v2756_v41, %v2753_v4  ;;  %v3242_v27 = vld [vmem:[%s6674_s8 + $0x20] sm:$0xff] (!%p4057_p9)  ;;  %v3243_v4 = vld [vmem:[%s6674_s8 + $0x28] sm:$0xff] (!%p4057_p9) }
 0x257   : > { %v2681_v32 = vadd.f32 %v2680_v21, %v2679_v3  ;;  %v2834_v60 = vand.u32 (!%p4057_p9), 4294901760, %v2833_v56  ;;  %v2841_v34 = vand.u32 (!%p4057_p9), 4294901760, %v2840_v45  ;;  %v4824_v29 = vpack.c.bf16 (!%p4057_p9), %v2840_v45, %v2833_v56 }
 0x258   : > { %v2650_v35 = vadd.f32 %v2649_v11, %v2648_v17  ;;  %v2848_v61 = vand.u32 (!%p4057_p9), 4294901760, %v2847_v57  ;;  %v2855_v63 = vand.u32 (!%p4057_p9), 4294901760, %v2854_v59  ;;  %4813 = vmatpush3.bf16.msra.mxu1 (!%p4057_p9), %v4812_v7  ;;  %v4827_v38 = vpack.c.bf16 (!%p4057_p9), %v2854_v59, %v2847_v57 }
 0x259   : > { %v2683_v0 = vadd.f32 %v2682_v44, %v2681_v32  ;;  %2692 = sbr.rel (%p4057_p9) target bundleno = 1814 (0x716), region = 176  ;;  %v2835_v2 = vsub.f32 (!%p4057_p9), %v2833_v56, %v2834_v60  ;;  %v2842_v5 = vsub.f32 (!%p4057_p9), %v2840_v45, %v2841_v34  ;;  %4814 = vmatprep.subr.bf16.mxu1 (!%p4057_p9), %v5437_v49  ;;  %v4815_v39 = vpack.c.bf16 (!%p4057_p9), %v2762_v47, %v2759_v42  ;;  %v3244_v47 = vld [vmem:[%s6674_s8 + $0x30] sm:$0xff] (!%p4057_p9)  ;;  %v3245_v56 = vld [vmem:[%s6674_s8 + $0x38] sm:$0xff] (!%p4057_p9) }
 0x25a   : > { %v2651_v50 = vadd.f32 %v2650_v35, %v2635_v31  ;;  %v2849_v9 = vsub.f32 (!%p4057_p9), %v2847_v57, %v2848_v61  ;;  %v2856_v6 = vsub.f32 (!%p4057_p9), %v2854_v59, %v2855_v63  ;;  %v4836_v24 = vpack.c.bf16 (!%p4057_p9), %v2841_v34, %v2834_v60 }
 0x25b   : > { %v2685_v16 = vadd.f32 %v2684_v15, %v2683_v0  ;;  %v2836_v12 = vand.u32 (!%p4057_p9), 4294901760, %v2835_v2  ;;  %v2843_v13 = vand.u32 (!%p4057_p9), 4294901760, %v2842_v5  ;;  %v4839_v23 = vpack.c.bf16 (!%p4057_p9), %v2855_v63, %v2848_v61 }
 0x25c   : > { %2652 = vst.msk [vmem:[#allocation3] sm:$0xff] %vm803_vm1, %v2651_v50  ;;  %v2850_v14 = vand.u32 (!%p4057_p9), 4294901760, %v2849_v9  ;;  %v2857_v18 = vand.u32 (!%p4057_p9), 4294901760, %v2856_v6  ;;  %4816 = vmatpush3.bf16.msra.mxu1 (!%p4057_p9), %v4815_v39  ;;  %v6353_v50 = vld [vmem:[%s6672_s16] ss:$0 sm:$0xff] (!%p4057_p9)  ;;  %v3270_v41 = vand.u32 (!%p4057_p9), 4294901760, %v3242_v27 }
 0x25d   : > { %v2686_v37 = vadd.f32 %v2685_v16, %v2654_v1  ;;  %v4818_v22 = vpack.c.bf16 (!%p4057_p9), %v2843_v13, %v2836_v12  ;;  %4847 = vmatprep.subr.bf16.mxu1 (!%p4057_p9), %v5437_v49  ;;  %v3273_v10 = vand.u32 (!%p4057_p9), 4294901760, %v3243_v4  ;;  %v3276_v45 = vand.u32 (!%p4057_p9), 4294901760, %v3244_v47 }
 0x25e   : > { %v4821_v33 = vpack.c.bf16 (!%p4057_p9), %v2857_v18, %v2850_v14  ;;  %v3279_v57 = vand.u32 (!%p4057_p9), 4294901760, %v3245_v56  ;;  %v6433_v61 = vsub.f32 (!%p4057_p9), %v3242_v27, %v3270_v41 }
 0x25f   : > { %2687 = vst.msk [vmem:[#allocation4] sm:$0xff] %vm803_vm1, %v2686_v37  ;;  %4819 = vmatpush3.bf16.msra.mxu0 (!%p4057_p9), %v4818_v22  ;;  %v6415_v42 = vpack.c.bf16 (!%p4057_p9), %v3273_v10, %v3270_v41  ;;  %v6435_v63 = vsub.f32 (!%p4057_p9), %v3243_v4, %v3273_v10  ;;  %v6438_v2 = vsub.f32 (!%p4057_p9), %v3244_v47, %v3276_v45 }
 0x260   : > { %4820 = vmatprep.subr.bf16.mxu0 %v5437_v49  ;;  %v6427_v59 = vpack.c.bf16 %v3279_v57, %v3276_v45  ;;  %v6440_v5 = vsub.f32 %v3245_v56, %v3279_v57 }
 0x263   : > { %v2693_v36 = vld [vmem:[#allocation3] sm:$0xff]  ;;  %4822 = vmatpush3.bf16.msra.mxu0 %v4821_v33 }
 0x264   : > { %vm2694_vm3 = vcmp.gt.f32.partialorder %v2693_v36, 0.0  ;;  %4823 = vmatprep.subr.bf16.mxu0 %v5437_v49 }
 0x265   : > { %v2695_v40 = vsel %vm2694_vm3, %v2693_v36, 1.0 }
 0x266   : > { %5158 = vrcp.f32 %v2695_v40  ;;  %v2697_v19 = vld [vmem:[#allocation4] sm:$0xff] }
 0x270   : > { %v5159_v30 = vpop.eup %5158 }
 0x271   : > { %v2699_v28 = vmul.f32 %v5159_v30, %v2697_v19  ;;  %v3238_v30 = vld [vmem:[%s6673_s21] sm:$0xff] }
 0x273   : > { %v2700_v52 = vadd.f32 %v2699_v28, %v2696_v20  ;;  %v3239_v20 = vld [vmem:[%s6674_s8 + $0x8] sm:$0xff]  ;;  %v3258_v28 = vand.u32 4294901760, %v3238_v30 }
 0x275   : > { %v2703_v54 = vsel %vm803_vm1, %v2700_v52, 0.0 }
 0x276   : > { %2704 = vadd.xlane.f32.xlu0 %v2703_v54 }
 0x303   : > { %v2705_v62 = vpop.xlane.xlu0 %2704 }
 0x304   : > { %v2707_v51 = vmul.f32 0.03125, %v2705_v62  ;;  %v6389_v62 = vsub.f32 %v3238_v30, %v3258_v28  ;;  %v4881_v30 = vpack.c.bf16 %v6440_v5, %v6438_v2 }
 0x306   : > { %v6317_v55 = vsub.f32 %v2700_v52, %v2707_v51  ;;  %v3261_v52 = vand.u32 4294901760, %v3239_v20  ;;  %v3343_v9 = vand.u32 4294901760, %v6389_v62 }
 0x308   : > { %v2709_v26 = vmul.f32 %v6317_v55, %v6317_v55  ;;  %v6387_v54 = vpack.c.bf16 %v3261_v52, %v3258_v28  ;;  %v6391_v51 = vsub.f32 %v3239_v20, %v3261_v52  ;;  %v3344_v12 = vsub.f32 %v6389_v62, %v3343_v9 }
 0x30a   : > { %v2710_v48 = vsel %vm803_vm1, %v2709_v26, 0.0  ;;  %v3241_v26 = vld [vmem:[%s6674_s8 + $0x18] sm:$0xff]  ;;  %v3350_v6 = vand.u32 4294901760, %v6391_v51  ;;  %v3345_v14 = vand.u32 4294901760, %v3344_v12 }
 0x30b   : > { %2711 = vadd.xlane.f32.xlu0 %v2710_v48  ;;  %v3267_v46 = vand.u32 4294901760, %v3241_v26 }
 0x30c   : > { %v3351_v13 = vsub.f32 %v6391_v51, %v3350_v6  ;;  %v4896_v20 = vpack.c.bf16 %v3350_v6, %v3343_v9 }
 0x30d   : > { %v6431_v34 = vsub.f32 %v3241_v26, %v3267_v46 }
 0x30e   : > { %v3352_v18 = vand.u32 4294901760, %v3351_v13 }
 0x30f   : > { %v3364_v33 = vand.u32 4294901760, %v6431_v34 }
 0x398   : > { %v2712_v53 = vpop.xlane.xlu0 %2711 }
 0x399   : > { %v2713_v8 = vmul.f32 0.03125, %v2712_v53  ;;  %v3378_v53 = vand.u32 4294901760, %v6435_v63 }
 0x39b   : > { %v2714_v17 = vadd.f32 1e-05, %v2713_v8 }
 0x39d   : > { %5160 = vrsqrt.f32 %v2714_v17  ;;  %vm2717_vm5 = vcmp.eq.f32.partialorder %v2714_v17, inf  ;;  %v2720_v21 = vand.u32 2147483648, %v2714_v17  ;;  %vm2719_vm6 = vcmp.eq.f32.partialorder %v2714_v17, 0.0 }
 0x3a7   : > { %v5161_v3 = vpop.eup %5160 }
 0x3a8   : > { %v2716_v11 = vmul.f32 %v5161_v3, %v2714_v17  ;;  %v3379_v3 = vsub.f32 %v6435_v63, %v3378_v53 }
 0x3aa   : > { %v2718_v31 = vsel %vm2717_vm5, %v2714_v17, %v2716_v11 }
 0x3ab   : > { %v2721_v35 = vsel %vm2719_vm6, %v2720_v21, %v2718_v31  ;;  %v3380_v21 = vand.u32 4294901760, %v3379_v3  ;;  %v3385_v31 = vand.u32 4294901760, %v6438_v2 }
 0x3ac   : > { %5162 = vrcp.f32 %v2721_v35  ;;  %v3392_v35 = vand.u32 4294901760, %v6440_v5 }
 0x3b6   : > { %v5163_v32 = vpop.eup %5162 }
 0x3b7   : > { %v2723_v44 = vmul.f32 %v5163_v32, %v6317_v55  ;;  %v3240_v55 = vld [vmem:[%s6674_s8 + $0x10] sm:$0xff] }
 0x3b8   : > { %v3264_v48 = vand.u32 4294901760, %v3240_v55 }
 0x3b9   : > { %v2730_v0 = vmul.f32 %v6347_v25, %v2723_v44  ;;  %v3386_v44 = vsub.f32 %v6438_v2, %v3385_v31 }
 0x3ba   : > { %v6403_v58 = vpack.c.bf16 %v3267_v46, %v3264_v48  ;;  %v6429_v60 = vsub.f32 %v3240_v55, %v3264_v48  ;;  %v4905_v55 = vpack.c.bf16 %v3392_v35, %v3385_v31  ;;  %v4060_v46 = vld [vmem:[%s6675_s7] ss:$0 sm:$0xff] }
 0x3bb   : > { %v6357_v15 = vadd.f32 %v6353_v50, %v2730_v0  ;;  %v3393_v0 = vsub.f32 %v6440_v5, %v3392_v35 }
 0x3bc   : > { %v3357_v22 = vand.u32 4294901760, %v6429_v60 }
 0x3bd   : > { %v2750_v1 = vsel %vm803_vm1, %v6357_v15, 0 }
 0x3be   : > { %v2821_v16 = vand.u32 4294901760, %v2750_v1  ;;  %v4899_v28 = vpack.c.bf16 %v3364_v33, %v3357_v22 }
 0x3c0   : > { %4555 = vmatmul.mubr.f32.vlgmr.msra.gmra.mrb[0].mxu0 %v2821_v16  ;;  %v2822_v37 = vsub.f32 %v2750_v1, %v2821_v16  ;;  %v3387_v1 = vand.u32 4294901760, %v3386_v44 }
 0x3c1   : > { %4825 = vmatpush3.bf16.msra.mxu0 %v4824_v29  ;;  %4565 = vmatprep.mubr.msk.f32.mxu0 %vm5438_vm4, %v5439_v43  ;;  %v4860_v29 = vpack.c.bf16 %v3352_v18, %v3345_v14 }
 0x3c2   : > { %4826 = vmatprep.subr.bf16.mxu0 %v5437_v49  ;;  %v2823_v36 = vand.u32 4294901760, %v2822_v37 }
 0x3c4   : > { %v2824_v40 = vsub.f32 %v2822_v37, %v2823_v36 }
 0x3c5   : > { %4828 = vmatpush3.bf16.msra.mxu0 %v4827_v38  ;;  %v3365_v38 = vsub.f32 %v6431_v34, %v3364_v33 }
 0x3c6   : > { %4829 = vmatprep.subr.bf16.mxu0 %v5437_v49  ;;  %v2825_v19 = vand.u32 4294901760, %v2824_v40  ;;  %v4875_v40 = vpack.c.bf16 %v6431_v34, %v6429_v60  ;;  %v4061_v34 = vld [vmem:[%s6676_s18] ss:$0 sm:$0xff] }
 0x3c8   : > { %4544 = vmatmul.mubr.f32.vlgmr.msra.gmra.mrb[0].mxu1 %v2825_v19  ;;  %4566 = vmatmul.mubr.f32.vlgmr.msra.gmra.mrb[0].mxu0 %v2822_v37  ;;  %v4878_v19 = vpack.c.bf16 %v6435_v63, %v6433_v61 }
 0x3c9   : > { %4831 = vmatpush3.bf16.msra.mxu0 %v4812_v7  ;;  %4576 = vmatprep.mubr.msk.f32.mxu0 %vm5438_vm4, %v5439_v43 }
 0x3ca   : > { %4832 = vmatprep.subr.bf16.mxu0 %v5437_v49  ;;  %4617 = vmatprep.mubr.msk.f32.mxu1 %vm5438_vm4, %v5439_v43 }
 0x3cb   : > { %4849 = vmatpush3.bf16.msra.mxu1 %v6387_v54 }
 0x3cc   : > { %4850 = vmatprep.subr.bf16.mxu1 %v5437_v49 }
 0x3cd   : > { %4834 = vmatpush3.bf16.msra.mxu0 %v4815_v39 }
 0x3ce   : > { %4835 = vmatprep.subr.bf16.mxu0 %v5437_v49 }
 0x3cf   : > { %4852 = vmatpush3.bf16.msra.mxu1 %v6403_v58 }
 0x3d0   : > { %4577 = vmatmul.mubr.f32.vlgmr.msra.gmra.mrb[0].mxu0 %v2823_v36  ;;  %4853 = vmatprep.subr.bf16.mxu1 %v5437_v49  ;;  %v4872_v36 = vpack.c.bf16 %v6391_v51, %v6389_v62 }
 0x3d1   : > { %4837 = vmatpush3.bf16.msra.mxu0 %v4836_v24  ;;  %4587 = vmatprep.mubr.msk.f32.mxu0 %vm5438_vm4, %v5439_v43  ;;  %v3366_v24 = vand.u32 4294901760, %v3365_v38 }
 0x3d2   : > { %4838 = vmatprep.subr.bf16.mxu0 %v5437_v49 }
 0x3d3   : > { %4855 = vmatpush3.bf16.msra.mxu1 %v6415_v42 }
 0x3d4   : > { %4856 = vmatprep.subr.bf16.mxu1 %v5437_v49 }
 0x3d5   : > { %4840 = vmatpush3.bf16.msra.mxu0 %v4839_v23  ;;  %v3371_v23 = vand.u32 4294901760, %v6433_v61 }
 0x3d6   : > { %4841 = vmatprep.subr.bf16.mxu0 %v5437_v49 }
 0x3d7   : > { %4858 = vmatpush3.bf16.msra.mxu1 %v6427_v59  ;;  %v3372_v17 = vsub.f32 %v6433_v61, %v3371_v23  ;;  %v4902_v52 = vpack.c.bf16 %v3378_v53, %v3371_v23 }
 0x3d8   : > { %4588 = vmatmul.mubr.f32.vlgmr.msra.gmra.mrb[0].mxu0 %v2821_v16  ;;  %4859 = vmatprep.subr.bf16.mxu1 %v5437_v49 }
 0x3d9   : > { %4843 = vmatpush3.bf16.msra.mxu0 %v4812_v7  ;;  %4598 = vmatprep.mubr.msk.f32.mxu0 %vm5438_vm4, %v5439_v43  ;;  %v3358_v7 = vsub.f32 %v6429_v60, %v3357_v22  ;;  %v3373_v11 = vand.u32 4294901760, %v3372_v17 }
 0x3da   : > { %4844 = vmatprep.subr.bf16.mxu0 %v5437_v49 }
 0x3db   : > { %v4866_v32 = vpack.c.bf16 %v3380_v21, %v3373_v11 }
 0x3dd   : > { %4846 = vmatpush3.bf16.msra.mxu0 %v4815_v39  ;;  %v3359_v39 = vand.u32 4294901760, %v3358_v7 }
 0x3de   : > { %4883 = vmatprep.subr.bf16.mxu0 %v5437_v49 }
 0x3df   : > { %v4863_v8 = vpack.c.bf16 %v3366_v24, %v3359_v39 }
 0x3e0   : > { %4599 = vmatmul.mubr.f32.vlgmr.msra.gmra.mrb[0].mxu0 %v2821_v16  ;;  %v3394_v16 = vand.u32 4294901760, %v3393_v0 }
 0x3e1   : > { %4674 = vmatprep.mubr.msk.f32.mxu0 %vm5438_vm4, %v5439_v43  ;;  %4885 = vmatpush3.bf16.msra.mxu0 %v6387_v54 }
 0x3e2   : > { %4886 = vmatprep.subr.bf16.mxu0 %v5437_v49  ;;  %v4869_v37 = vpack.c.bf16 %v3394_v16, %v3387_v1 }
 0x3e5   : > { %4888 = vmatpush3.bf16.msra.mxu0 %v6403_v58 }
 0x3e6   : > { %4889 = vmatprep.subr.bf16.mxu0 %v5437_v49 }
 0x3e9   : > { %4891 = vmatpush3.bf16.msra.mxu0 %v6415_v42 }
 0x3ea   : > { %4892 = vmatprep.subr.bf16.mxu0 %v5437_v49 }
 0x3ed   : > { %4894 = vmatpush3.bf16.msra.mxu0 %v6427_v59 }
 0x3ee   : > { %4907 = vmatprep.subr.bf16.mxu0 %v5437_v49 }
 0x49b   : > { %v2827_v26 = vpop.f32.mrb[0].mxu1 }
 0x49c   : > { %v4545_v48 = vpop.f32.mrb[1].mxu1  ;;  %v2828_v62 = vadd.f32 %v4060_v46, %v2827_v26 }
 0x4b3   : > { %v3233_v51 = vpop.f32.mrb[0].mxu0 }
 0x4b4   : > { %v5000_v27 = vadd.f32 %v3233_v51, %v2828_v62  ;;  %v4600_v4 = vpop.f32.mrb[1].mxu0 }
 0x4b6   : > { %v3237_v41 = vmax.f32 %v5000_v27, 0.0 }
 0x4b8   : > { %v3255_v10 = vsel %vm3253_vm7, %v3237_v41, 0 }
 0x4b9   : > { %v3330_v47 = vand.u32 4294901760, %v3255_v10 }
 0x4bb   : > { %v3331_v56 = vsub.f32 %v3255_v10, %v3330_v47 }
 0x4bd   : > { %v3332_v45 = vand.u32 4294901760, %v3331_v56 }
 0x4bf   : > { %4675 = vmatmul.mubr.f32.vlgmr.msra.gmra.mrb[2].mxu0 %v3332_v45  ;;  %v3333_v57 = vsub.f32 %v3331_v56, %v3332_v45 }
 0x4c0   : > { %4909 = vmatpush3.bf16.msra.mxu0 %v6387_v54  ;;  %4712 = vmatprep.mubr.msk.f32.mxu0 %vm5438_vm4, %v5439_v43 }
 0x4c1   : > { %4910 = vmatprep.subr.bf16.mxu0 %v5437_v49  ;;  %v3334_v60 = vand.u32 4294901760, %v3333_v57 }
 0x4c3   : > { %4618 = vmatmul.mubr.f32.vlgmr.msra.gmra.mrb[2].mxu1 %v3334_v60 }
 0x4c4   : > { %4861 = vmatpush3.bf16.msra.mxu1 %v4860_v29  ;;  %4912 = vmatpush3.bf16.msra.mxu0 %v6403_v58 }
 0x4c5   : > { %4862 = vmatprep.subr.bf16.mxu1 %v5437_v49  ;;  %4913 = vmatprep.subr.bf16.mxu0 %v5437_v49 }
 0x4c6   : > { %4636 = vmatprep.mubr.msk.f32.mxu1 %vm5438_vm4, %v5439_v43 }
 0x4c8   : > { %4864 = vmatpush3.bf16.msra.mxu1 %v4863_v8  ;;  %4915 = vmatpush3.bf16.msra.mxu0 %v6415_v42 }
 0x4c9   : > { %4865 = vmatprep.subr.bf16.mxu1 %v5437_v49  ;;  %4916 = vmatprep.subr.bf16.mxu0 %v5437_v49 }
 0x4cc   : > { %4867 = vmatpush3.bf16.msra.mxu1 %v4866_v32  ;;  %4918 = vmatpush3.bf16.msra.mxu0 %v6427_v59 }
 0x4cd   : > { %4868 = vmatprep.subr.bf16.mxu1 %v5437_v49 }
 0x4cf   : > { %4713 = vmatmul.mubr.f32.vlgmr.msra.gmra.mrb[4].mxu0 %v3330_v47 }
 0x4d0   : > { %4870 = vmatpush3.bf16.msra.mxu1 %v4869_v37 }
 0x4d1   : > { %4871 = vmatprep.subr.bf16.mxu1 %v5437_v49 }
 0x4d3   : > { %4637 = vmatmul.mubr.f32.vlgmr.msra.gmra.mrb[4].mxu1 %v3330_v47 }
 0x4d4   : > { %4873 = vmatpush3.bf16.msra.mxu1 %v4872_v36  ;;  %4655 = vmatprep.mubr.msk.f32.mxu1 %vm5438_vm4, %v5439_v43 }
 0x4d5   : > { %4874 = vmatprep.subr.bf16.mxu1 %v5437_v49 }
 0x4d8   : > { %4876 = vmatpush3.bf16.msra.mxu1 %v4875_v40 }
 0x4d9   : > { %4877 = vmatprep.subr.bf16.mxu1 %v5437_v49 }
 0x4dc   : > { %4879 = vmatpush3.bf16.msra.mxu1 %v4878_v19 }
 0x4dd   : > { %4880 = vmatprep.subr.bf16.mxu1 %v5437_v49 }
 0x4e0   : > { %4882 = vmatpush3.bf16.msra.mxu1 %v4881_v30 }
 0x4e1   : > { %4895 = vmatprep.subr.bf16.mxu1 %v5437_v49 }
 0x4e3   : > { %4656 = vmatmul.mubr.f32.vlgmr.msra.gmra.mrb[6].mxu1 %v3331_v56 }
 0x4e4   : > { %4897 = vmatpush3.bf16.msra.mxu1 %v4896_v20  ;;  %4693 = vmatprep.mubr.msk.f32.mxu1 %vm5438_vm4, %v5439_v43 }
 0x4e5   : > { %4898 = vmatprep.subr.bf16.mxu1 %v5437_v49 }
 0x4e8   : > { %4900 = vmatpush3.bf16.msra.mxu1 %v4899_v28 }
 0x4e9   : > { %4901 = vmatprep.subr.bf16.mxu1 %v5437_v49 }
 0x4ec   : > { %4903 = vmatpush3.bf16.msra.mxu1 %v4902_v52 }
 0x4ed   : > { %4904 = vmatprep.subr.bf16.mxu1 %v5437_v49 }
 0x4f0   : > { %4906 = vmatpush3.bf16.msra.mxu1 %v4905_v55 }
 0x4f3   : > { %4694 = vmatmul.mubr.f32.vlgmr.msra.gmra.mrb[8].mxu1 %v3330_v47 }
 0x592   : > { %v3616_v54 = vpop.f32.mrb[2].mxu0 }
 0x593   : > { %v4676_v58 = vpop.f32.mrb[3].mxu0 }
 0x596   : > { %v3336_v42 = vpop.f32.mrb[2].mxu1 }
 0x597   : > { %v4619_v59 = vpop.f32.mrb[3].mxu1  ;;  %v3337_v63 = vadd.f32 %v4061_v34, %v3336_v42 }
 0x5a2   : > { %v3790_v61 = vpop.f32.mrb[4].mxu0 }
 0x5a3   : > { %v4714_v43 = vpop.f32.mrb[5].mxu0 }
 0x5a6   : > { %v3447_v2 = vpop.f32.mrb[4].mxu1 }
 0x5a7   : > { %v3448_v5 = vadd.f32 %v3447_v2, %v3337_v63  ;;  %v4638_v9 = vpop.f32.mrb[5].mxu1 }
 0x5b6   : > { %v3535_v6 = vpop.f32.mrb[6].mxu1 }
 0x5b7   : > { %v3536_v12 = vadd.f32 %v3535_v6, %v3448_v5  ;;  %v4657_v13 = vpop.f32.mrb[7].mxu1 }
 0x5b9   : > { %v3617_v49 = vadd.f32 %v3616_v54, %v3536_v12 }
 0x5c6   : > { %v3711_v14 = vpop.f32.mrb[8].mxu1 }
 0x5c7   : > { %v3712_v18 = vadd.f32 %v3711_v14, %v3617_v49  ;;  %v4695_v22 = vpop.f32.mrb[9].mxu1 }
 0x5c9   : > { %v3791_v33 = vadd.f32 %v3790_v61, %v3712_v18 }
 0x5cb   : > { %v3794_v29 = vadd.f32 %v3791_v33, %v6357_v15 }
 0x5cd   : > { %v3795_v7 = vsel %vm803_vm1, %v3794_v29, 0.0 }
 0x5ce   : > { %3796 = vadd.xlane.f32.xlu1 %v3795_v7 }
 0x65b   : > { %v3797_v38 = vpop.xlane.xlu1 %3796 }
 0x65c   : > { %v3798_v39 = vmul.f32 0.03125, %v3797_v38 }
 0x65e   : > { %v3799_v24 = vsub.f32 %v3794_v29, %v3798_v39 }
 0x660   : > { %v3800_v23 = vmul.f32 %v3799_v24, %v3799_v24 }
 0x662   : > { %v3801_v53 = vsel %vm803_vm1, %v3800_v23, 0.0 }
 0x663   : > { %3802 = vadd.xlane.f32.xlu1 %v3801_v53 }
 0x6f0   : > { %v3803_v8 = vpop.xlane.xlu1 %3802 }
 0x6f1   : > { %v3804_v17 = vmul.f32 0.03125, %v3803_v8 }
 0x6f3   : > { %v3805_v3 = vadd.f32 1e-05, %v3804_v17 }
 0x6f5   : > { %5164 = vrsqrt.f32 %v3805_v3  ;;  %vm3808_vm8 = vcmp.eq.f32.partialorder %v3805_v3, inf  ;;  %v3811_v31 = vand.u32 2147483648, %v3805_v3  ;;  %vm3810_vm9 = vcmp.eq.f32.partialorder %v3805_v3, 0.0 }
 0x6ff   : > { %v5165_v11 = vpop.eup %5164 }
 0x700   : > { %v3807_v21 = vmul.f32 %v5165_v11, %v3805_v3 }
 0x702   : > { %v3809_v15 = vsel %vm3808_vm8, %v3805_v3, %v3807_v21 }
 0x703   : > { %v3812_v35 = vsel %vm3810_vm9, %v3811_v31, %v3809_v15 }
 0x704   : > { %5166 = vrcp.f32 %v3812_v35 }
 0x70e   : > { %v5167_v32 = vpop.eup %5166 }
 0x70f   : > { %v3814_v44 = vmul.f32 %v5167_v32, %v3799_v24 }
 0x711   : > { %v3815_v0 = vmul.f32 %v6347_v25, %v3814_v44 }
 0x713   : > { %v3816_v1 = vadd.f32 %v6353_v50, %v3815_v0 }
 0x715   : > { %3817 = vst.msk [vmem:[%s6677_s26] sm:$0xff] %vm803_vm1, %v3816_v1 }
 0x716 PF: > { %s6678_s6 = sld [smem:[#allocation24_spill]]  ;;  %s6679_s16 = sld [smem:[#allocation32_spill]] }
 0x717   : > { %s6680_s10 = sld [smem:[#allocation44_spill]]  ;;  %s6681_s29 = scalar_lea.vmem [#allocation15], %s5827_s1 }
 0x718   : > { %s3832_s7 = sshll.u32 %s6681_s29, 4  ;;  %s3819_s14 = scalar_lea.sflag [#allocation7], %s5824_s22  ;;  %s3833_s7 = int_to_ptr.vmem [resolvable:$true] %s3832_s7 }
 0x719   : > { %s5280_s15 = scalar_lea.vmem %s3833_s7, 128  ;;  %s5440_s18 = smov [#allocation15]  }
 0x71a   : > { %p5281_p1 = scmp.ne.s32.totalorder %s3833_s7, %s5280_s15  ;;  %s5284_s26 = sshll.u32 %s5440_s18, 4  ;;  %s5285_s26 = int_to_ptr.vmem [resolvable:$false] %s5284_s26 }
 0x71b   : > { %s5286_s0 = scalar_lea.vmem %s5285_s26, 256  ;;  %p5287_p10 = scmp.lt.s32.totalorder %s3833_s7, %s5285_s26 }
 0x71c   : > { %s4063_s11 = sshll.u32 %s6678_s6, 7  ;;  %p6682_p3 = scmp.ne.s32.totalorder %s6679_s16, 0 }
 0x71d   : > { %s6513_s12 = scalar_lea.hbm %s6680_s10, %s4063_s11  ;;  %p5288_p2 = scmp.lt.s32.totalorder %s5286_s0, %s5280_s15 }
 0x71e   : > { %p5282_p4 = pnand %p5281_p1, %p6682_p3 }
 0x71f   : > { %p5289_p12 = por %p5288_p2, %p5287_p10 }
 0x720   : > { %p5283_p5 = pneg %p5282_p4 }
 0x722   : > { %p5290_p13 = pnand %p5289_p12, %p5283_p5 }
 0x724   : > { %5293 = shalt.err (!%p5290_p13)
}
 0x725   : > { %s5294_s22 = scalar_lea.hbm %s6513_s12, 128  ;;  %s5298_s11 = scalar_lea.hbm %s6680_s10, 384 }
 0x726   : > { %p5295_p0 = scmp.ne.s32.totalorder %s6513_s12, %s5294_s22  ;;  %p5299_p7 = scmp.lt.u32.totalorder %s6513_s12, %s6680_s10 }
 0x727   : > { %p5300_p11 = scmp.lt.u32.totalorder %s5298_s11, %s5294_s22  ;;  %p5302_p1 = scmp.lt.u32.totalorder %s5294_s22, %s6513_s12 }
 0x728   : > { %p5296_p8 = pnand %p5295_p0, %p6682_p3 }
 0x729   : > { %p5301_p9 = por %p5300_p11, %p5299_p7 }
 0x72a   : > { %p5297_p6 = pneg %p5296_p8 }
 0x72b   : > { %p5303_p4 = por %p5302_p1, %p5301_p9 }
 0x72d   : > { %p5304_p5 = pnand %p5303_p4, %p5297_p6 }
 0x72f   : > { %5307 = shalt.err (!%p5304_p5)
}
 0x730   : > { %5019 = dma.vmem_to_hbm [thread:$0]  (%p6682_p3), %s3833_s7, 128, %s6513_s12, %s3819_s14  }
 0x731 PF: > { %s6683_s0 = sld [smem:[#allocation21_spill]]  ;;  %s6684_s29 = sld [smem:[#allocation33_spill]] }
 0x732   : > { %p5025_p10 = scmp.ge.s32.totalorder %s5426_s25, 2 }
 0x737   : > { %s3844_s15 = sand.u32 1, %s6683_s0   ;;  %p6685_p2 = scmp.ne.s32.totalorder %s6684_s29, 0 }
 0x738   : > { %s3845_s18 = scalar_lea.sflag [#allocation7], %s3844_s15 }
 0x739   : > { %p5022_p12 = pnand %p5025_p10, %p6685_p2 }
 0x73b   : > { %5373 = dma.done.wait (!%p5022_p12), %s3845_s18, 128  }
 0x73c   : > { %5375 = vsyncadd (!%p5022_p12), %s3845_s18, 4294967168  ;;  %s36_s25 = sadd.s32 1, %s5426_s25   ;;  %s6687_s16 = sld [smem:[#allocation31_spill]] }
 0x73d   : > { %p6540_p13 = scmp.ge.s32.totalorder %s36_s25, 11   ;;  %s6688_s15 = sld [smem:[#allocation22_spill]] }
 0x73e   : > { %s6689_s12 = sld [smem:[#allocation29_spill]]  ;;  %s6690_s7 = sld [smem:[#allocation28_spill]] }
 0x73f   : > { %s6691_s14 = sld [smem:[#allocation26_spill]]  ;;  %s6692_s1 = sld [smem:[#allocation27_spill]] }
 0x740   : > { %s6693_s29 = smov %s5382_s30  ;;  %s6697_s18 = smov %s5402_s19 }
 0x741   : > { %s6698_s19 = smov %s5406_s20  ;;  %s6700_s21 = smov %s5418_s23 }
 0x742   : > { %s6694_s30 = smov %s6687_s16  ;;  %s6695_s16 = smov %s5394_s17 }
 0x743   : > { %s6701_s22 = smov %s5422_s24  ;;  %35 = sbr.rel (!%p6540_p13) target bundleno = 26 (0x1a), region = 258 }
 0x744   : > { %s6696_s17 = smov %s6689_s12  ;;  %s6699_s20 = smov %s6690_s7 }
 0x745   : > { %s6702_s23 = smov %s6691_s14  ;;  %s6703_s24 = smov %s6692_s1 }
 0x74a   :  { %3850 = vsyncpa [#allocation6], 1 }
 0x74b   :  { %3852 = vsyncpa [#allocation6 + $0x1], 1 }
 0x74c   :  { %3853 = vsyncpa [#allocation9], 1 }
 0x74d   :  { %3855 = vsyncpa [#allocation9 + $0x1], 1 }
 0x74e   :  { %3856 = vsyncpa [#allocation12], 1 }
 0x74f   :  { %3858 = vsyncpa [#allocation12 + $0x1], 1 }
 0x750   :  { %3859 = vsyncpa [#allocation7], 1 }
 0x751   :  { %3861 = vsyncpa [#allocation7 + $0x1], 1 }

</bundles_post_ra>
